<compile_context>
chip_gen: v6e
topology: v6e:2x2x1
jax: 0.10.0
libtpu: 0.0.40
codegen_flags: <defaults>
</compile_context>

<pallas_src>
import jax
import jax.numpy as jnp
from jax.experimental import pallas as pl
from jax.experimental.pallas import tpu as pltpu

HID = 768          # BERT hidden size (fixed by the module: 768*3+1 input features)
SEQ = 8            # small sequence length
BATCH = 64         # fixed by the module: reshape([64, 768]) on CLS tokens
MLP = 256
VOCAB = 100


def head_kernel(xsel_ref, w1a_ref, b1_ref, w2_ref, b2_ref, o_ref):
    """relu(xsel @ W1a + b1_eff) -> w2 reduce + b2 -> ReLU -> sigmoid, all fused."""
    # [64,2304] bf16 @ [2304,256] bf16 -> f32 accumulate on the MXU.
    h = jnp.dot(xsel_ref[...], w1a_ref[...], preferred_element_type=jnp.float32)
    h = jnp.maximum(h + b1_ref[...], 0.0)                            # [64, 256] f32
    # Linear(256,1) has a single output column: a 1-wide MXU matmul wastes the
    # systolic array, so do it as a VPU multiply + cross-lane (XLU) reduction.
    logit = jnp.sum(h * w2_ref[...], axis=-1, keepdims=True) + b2_ref[0, 0]  # [64,1]
    logit = jnp.maximum(logit, 0.0)
    # sigmoid in-kernel: exp goes to the EUP slot, which is idle here.
    o_ref[...] = 1.0 / (1.0 + jnp.exp(-logit))


def head_pallas(xsel, w1a, b1_eff, w2_row, b2):
    n = xsel.shape[0]
    # Gridless call: whole working set (~1.6 MB) sits in VMEM on every TPU
    # generation, so there is nothing to tile or pipeline.
    return pl.pallas_call(
        head_kernel,
        out_shape=jax.ShapeDtypeStruct((n, 1), jnp.float32),
        in_specs=[
            pl.BlockSpec(memory_space=pltpu.MemorySpace.VMEM),   # xsel   [64, 2304] bf16
            pl.BlockSpec(memory_space=pltpu.MemorySpace.VMEM),   # W1a    [2304, 256] bf16
            pl.BlockSpec(memory_space=pltpu.MemorySpace.VMEM),   # b1_eff [1, 256]    f32
            pl.BlockSpec(memory_space=pltpu.MemorySpace.VMEM),   # w2 row [1, 256]    f32
            pl.BlockSpec(memory_space=pltpu.MemorySpace.SMEM),   # b2     [1, 1]      f32
        ],
        out_specs=pl.BlockSpec(memory_space=pltpu.MemorySpace.VMEM),
    )(xsel, w1a, b1_eff, w2_row, b2)


def prepare_head_params(params):
    """One-time weight prep (hoisted out of forward): bf16 cast of the big matmul
    weight, cosine-sim==1 folded into the hidden bias, w2 laid out as a lane row,
    b2 as a (1,1) scalar for SMEM."""
    w1a = params["w1"][: HID * 3].astype(jnp.bfloat16)             # [2304, 256]
    b1_eff = (params["b1"] + params["w1"][HID * 3])[None, :]       # [1, 256] (sim == 1 fold)
    w2_row = params["w2"].reshape(1, MLP).astype(jnp.float32)      # [1, 256]
    b2 = params["b2"].reshape(1, 1).astype(jnp.float32)            # [1, 1]
    return {"w1a": w1a, "b1_eff": b1_eff, "w2_row": w2_row, "b2": b2}


def fake_robert(token_ids, embed_table):
    # TODO(synk): the pretrained 12-layer BertModel ('../aibert') is not reproduced;
    # a deterministic embedding + layer-norm surrogate stands in for its [B,S,768] output.
    h = embed_table[token_ids]
    mu = jnp.mean(h, axis=-1, keepdims=True)
    var = jnp.var(h, axis=-1, keepdims=True)
    return (h - mu) * jax.lax.rsqrt(var + 1e-12)


@jax.jit
def forward(ids0, ids1, ids2, mask, embed, head):
    out0 = fake_robert(ids0, embed)   # out = RoBert(x[0])[0]

    # RoBert(x[1]) / RoBert(x[2]) only feed cosine_similarity(tensor1, tensor2)
    # where the original module sets tensor2 = reshape(tensor1, ...), so sim == 1
    # for any nonzero CLS embedding; that constant feature is already folded into
    # head["b1_eff"], making these branches dead code.
    del ids1, ids2

    # torch.masked_select(out, x[3]).reshape([-1, 768*3]) -- static-count mask glue.
    # TODO(synk): gather stays in XLA; fusing it in-kernel would need ~192 tiny
    # row DMAs / grid steps, which costs more than the ~0.6 MB gather at this size.
    rows, cols = jnp.nonzero(mask[..., 0], size=BATCH * 3)
    xsel = out0[rows, cols, :].reshape(BATCH, HID * 3).astype(jnp.bfloat16)

    return head_pallas(xsel, head["w1a"], head["b1_eff"], head["w2_row"], head["b2"])


if __name__ == "__main__":
    key = jax.random.PRNGKey(0)
    k_e, k_w1, k_b1, k_w2, k_b2, k0, k1, k2 = jax.random.split(key, 8)

    params = {
        "embed": 0.02 * jax.random.normal(k_e, (VOCAB, HID), jnp.float32),
        "w1": 0.02 * jax.random.normal(k_w1, (HID * 3 + 1, MLP), jnp.float32),
        "b1": 0.02 * jax.random.normal(k_b1, (MLP,), jnp.float32),
        "w2": 0.02 * jax.random.normal(k_w2, (MLP, 1), jnp.float32),
        "b2": 0.02 * jax.random.normal(k_b2, (1,), jnp.float32),
    }
    head = prepare_head_params(params)   # hoisted: done once, not per call

    ids0 = jax.random.randint(k0, (BATCH, SEQ), 0, VOCAB, dtype=jnp.int32)
    ids1 = jax.random.randint(k1, (BATCH, SEQ), 0, VOCAB, dtype=jnp.int32)
    ids2 = jax.random.randint(k2, (BATCH, SEQ), 0, VOCAB, dtype=jnp.int32)

    # boolean mask x[3]: exactly 3 token positions per sequence -> 64*3*768 selected elems
    b = jnp.arange(BATCH)
    pos = jnp.stack([b % SEQ, (b + 3) % SEQ, (b + 6) % SEQ], axis=1)     # 3 distinct positions
    mask = jnp.zeros((BATCH, SEQ), dtype=bool).at[b[:, None], pos].set(True)[..., None]

    y = forward(ids0, ids1, ids2, mask, params["embed"], head)
    jax.block_until_ready(y)
    assert y.shape == (BATCH, 1)
    assert bool(jnp.all((y >= 0.0) & (y <= 1.0)))
    print("KERNEL_OK")
</pallas_src>

<mosaic_0001>
module attributes {stable_mosaic.version = 11 : i64} {
  func.func private @main(%arg0: i32) attributes {dimension_semantics = [#tpu.dimension_semantics<core_parallel>], iteration_bounds = array<i64: 2>, tpu.core_type = #tpu.core_type<sc_scalar_subcore>, window_params = []} {
    return
  }
}

module attributes {stable_mosaic.version = 11 : i64} {
  func.func private @main(%arg0: i32) attributes {dimension_semantics = [#tpu.dimension_semantics<core_parallel>], iteration_bounds = array<i64: 2>, tpu.core_type = #tpu.core_type<sc_scalar_subcore>, window_params = []} {
    return
  }
}

module attributes {stable_mosaic.version = 11 : i64} {
  func.func @head_kernel(%arg0: memref<64x2304xbf16, #tpu.memory_space<vmem>>, %arg1: memref<2304x256xbf16, #tpu.memory_space<vmem>>, %arg2: memref<1x256xf32, #tpu.memory_space<vmem>>, %arg3: memref<1x256xf32, #tpu.memory_space<vmem>>, %arg4: memref<1x1xf32, #tpu.memory_space<smem>>, %arg5: memref<64x1xf32, #tpu.memory_space<vmem>>) attributes {dimension_semantics = [], scalar_prefetch = 0 : i64, scratch_operands = 0 : i64, tpu.core_type = #tpu.core_type<tc>} {
    %c0 = arith.constant 0 : index
    %c0_0 = arith.constant 0 : index
    %0 = vector.load %arg0[%c0, %c0_0] : memref<64x2304xbf16, #tpu.memory_space<vmem>>, vector<64x2304xbf16>
    %c0_1 = arith.constant 0 : index
    %c0_2 = arith.constant 0 : index
    %1 = vector.load %arg1[%c0_1, %c0_2] : memref<2304x256xbf16, #tpu.memory_space<vmem>>, vector<2304x256xbf16>
    %cst = arith.constant dense<0.000000e+00> : vector<64x256xf32>
    %2 = tpu.matmul %0, %1, %cst {dimension_numbers = #tpu.dot_dimension_numbers<[1], [0], [0], [1], [0, 0, 1, 1], [], []>} : vector<64x2304xbf16>, vector<2304x256xbf16>, vector<64x256xf32> -> vector<64x256xf32>
    %c0_3 = arith.constant 0 : index
    %c0_4 = arith.constant 0 : index
    %3 = vector.load %arg2[%c0_3, %c0_4] : memref<1x256xf32, #tpu.memory_space<vmem>>, vector<1x256xf32>
    %4 = vector.broadcast %3 : vector<1x256xf32> to vector<64x256xf32>
    %5 = arith.addf %2, %4 : vector<64x256xf32>
    %cst_5 = arith.constant 0.000000e+00 : f32
    %6 = vector.broadcast %cst_5 : f32 to vector<64x256xf32>
    %7 = arith.maximumf %5, %6 : vector<64x256xf32>
    %c0_6 = arith.constant 0 : index
    %c0_7 = arith.constant 0 : index
    %8 = vector.load %arg3[%c0_6, %c0_7] : memref<1x256xf32, #tpu.memory_space<vmem>>, vector<1x256xf32>
    %9 = vector.broadcast %8 : vector<1x256xf32> to vector<64x256xf32>
    %10 = arith.mulf %7, %9 : vector<64x256xf32>
    %cst_8 = arith.constant dense<0.000000e+00> : vector<64xf32>
    %11 = vector.multi_reduction <add>, %10, %cst_8 [1] : vector<64x256xf32> to vector<64xf32>
    %12 = vector.shape_cast %11 : vector<64xf32> to vector<64x1xf32>
    %c0_9 = arith.constant 0 : index
    %c0_10 = arith.constant 0 : index
    %13 = memref.load %arg4[%c0_9, %c0_10] : memref<1x1xf32, #tpu.memory_space<smem>>
    %14 = vector.broadcast %13 : f32 to vector<64x1xf32>
    %15 = arith.addf %12, %14 : vector<64x1xf32>
    %cst_11 = arith.constant 0.000000e+00 : f32
    %16 = vector.broadcast %cst_11 : f32 to vector<64x1xf32>
    %17 = arith.maximumf %15, %16 : vector<64x1xf32>
    %cst_12 = arith.constant 0.000000e+00 : f32
    %18 = vector.broadcast %cst_12 : f32 to vector<64x1xf32>
    %19 = arith.subf %18, %17 : vector<64x1xf32>
    %20 = math.exp %19 : vector<64x1xf32>
    %cst_13 = arith.constant 1.000000e+00 : f32
    %21 = vector.broadcast %cst_13 : f32 to vector<64x1xf32>
    %22 = arith.addf %21, %20 : vector<64x1xf32>
    %cst_14 = arith.constant 1.000000e+00 : f32
    %23 = vector.broadcast %cst_14 : f32 to vector<64x1xf32>
    %24 = arith.divf %23, %22 : vector<64x1xf32>
    %c0_15 = arith.constant 0 : index
    %c0_16 = arith.constant 0 : index
    %25 = vector.load %arg5[%c0_15, %c0_16] : memref<64x1xf32, #tpu.memory_space<vmem>>, vector<64x1xf32>
    tpu.vector_store %arg5[%c0_15, %c0_16], %24 {strides = array<i32>} : memref<64x1xf32, #tpu.memory_space<vmem>>, vector<64x1xf32>,
    return
  }
}

</mosaic_0001>

<bundles_post_ra>
// kernel: forward.1
= control target key start
LH: loop header
LB: loop body
LE: loop exit
PB: predicated region body
PF: predicated region fallthrough
CT: control target
= control target key end

     0   :  { %vm2984_vm0 = vcmask 7168   ;;  %s5353_s1 = inlined_call_operand.vmem [shape: bf16[2304,256], index: 1, kind: input, shape index: {}]   ;;  %s5354_s0 = inlined_call_operand.vmem [shape: bf16[64,2304], index: 0, kind: input, shape index: {}]   ;;  %s5355_s2 = inlined_call_operand.vmem [shape: f32[1,256], index: 2, kind: input, shape index: {}]   ;;  %s5356_s3 = inlined_call_operand.vmem [shape: f32[1,256], index: 3, kind: input, shape index: {}]   ;;  %s5357_s4 = inlined_call_operand.<no memory space> [shape: f32[1,1], index: 4, kind: input, shape index: {}]   ;;  %s5358_s5 = inlined_call_operand.vmem [shape: f32[64,1], index: 5, kind: output, shape index: {}]  }
   0x1   :  { %v3389_v0 = vld [vmem:[%s5353_s1 + $0x74] ss:$8 sps:$4 sm:$0xff]   ;;  %v3393_v2 = vld [vmem:[%s5353_s1 + $0x70] ss:$8 sps:$4 sm:$0xff]   ;;  %v3395_v4 = vld [vmem:[%s5353_s1 + $0x64] ss:$8 sps:$4 sm:$0xff]  }
   0x2   :  { %v3391_v1 = vld [vmem:[%s5353_s1 + $0x174] ss:$8 sps:$4 sm:$0xff]   ;;  %2193 = vmatprep.subr.bf16.mxu0 %v3389_v0  ;;  %v3394_v3 = vld [vmem:[%s5353_s1 + $0x170] ss:$8 sps:$4 sm:$0xff]   ;;  %v3397_v5 = vld [vmem:[%s5353_s1 + $0x164] ss:$8 sps:$4 sm:$0xff]  }
   0x3   :  { %2266 = vmatprep.subr.bf16.mxu1 %v3391_v1  ;;  %2194 = vmatpush1.bf16.msra.mxu0 %v3393_v2  ;;  %v3399_v6 = vld [vmem:[%s5353_s1 + $0x60] ss:$8 sps:$4 sm:$0xff]   ;;  %v3401_v8 = vld [vmem:[%s5353_s1 + $0x54] ss:$8 sps:$4 sm:$0xff]   ;;  %v3405_v10 = vld [vmem:[%s5353_s1 + $0x50] ss:$8 sps:$4 sm:$0xff]  }
   0x4   :  { %2267 = vmatpush1.bf16.msra.mxu1 %v3394_v3  ;;  %2195 = vmatprep.subr.bf16.mxu0 %v3395_v4  ;;  %v3400_v7 = vld [vmem:[%s5353_s1 + $0x160] ss:$8 sps:$4 sm:$0xff]   ;;  %v3403_v9 = vld [vmem:[%s5353_s1 + $0x154] ss:$8 sps:$4 sm:$0xff]   ;;  %v3406_v11 = vld [vmem:[%s5353_s1 + $0x150] ss:$8 sps:$4 sm:$0xff]  }
   0x5   :  { %2268 = vmatprep.subr.bf16.mxu1 %v3397_v5  ;;  %v3407_v12 = vld [vmem:[%s5353_s1 + $0x44] ss:$8 sps:$4 sm:$0xff]   ;;  %v3411_v14 = vld [vmem:[%s5353_s1 + $0x40] ss:$8 sps:$4 sm:$0xff]   ;;  %v3413_v16 = vld [vmem:[%s5353_s1 + $0x34] ss:$8 sps:$4 sm:$0xff]  }
   0x6   :  { %v3409_v13 = vld [vmem:[%s5353_s1 + $0x144] ss:$8 sps:$4 sm:$0xff]   ;;  %v3412_v15 = vld [vmem:[%s5353_s1 + $0x140] ss:$8 sps:$4 sm:$0xff]   ;;  %v3415_v17 = vld [vmem:[%s5353_s1 + $0x134] ss:$8 sps:$4 sm:$0xff]  }
   0x7   :  { %2196 = vmatpush1.bf16.msra.mxu0 %v3399_v6  ;;  %v3417_v18 = vld [vmem:[%s5353_s1 + $0x30] ss:$8 sps:$4 sm:$0xff]   ;;  %v3419_v20 = vld [vmem:[%s5353_s1 + $0x24] ss:$8 sps:$4 sm:$0xff]   ;;  %v3423_v22 = vld [vmem:[%s5353_s1 + $0x20] ss:$8 sps:$4 sm:$0xff]  }
   0x8   :  { %2269 = vmatpush1.bf16.msra.mxu1 %v3400_v7  ;;  %2197 = vmatprep.subr.bf16.mxu0 %v3401_v8  ;;  %v3418_v19 = vld [vmem:[%s5353_s1 + $0x130] ss:$8 sps:$4 sm:$0xff]   ;;  %v3421_v21 = vld [vmem:[%s5353_s1 + $0x124] ss:$8 sps:$4 sm:$0xff]   ;;  %v3424_v23 = vld [vmem:[%s5353_s1 + $0x120] ss:$8 sps:$4 sm:$0xff]  }
   0x9   :  { %2270 = vmatprep.subr.bf16.mxu1 %v3403_v9  ;;  %v3425_v24 = vld [vmem:[%s5353_s1 + $0x14] ss:$8 sps:$4 sm:$0xff]   ;;  %v3429_v26 = vld [vmem:[%s5353_s1 + $0x10] ss:$8 sps:$4 sm:$0xff]   ;;  %v3431_v28 = vld [vmem:[%s5353_s1 + $0x4] ss:$8 sps:$4 sm:$0xff]  }
   0xa   :  { %v3427_v25 = vld [vmem:[%s5353_s1 + $0x114] ss:$8 sps:$4 sm:$0xff]   ;;  %v3430_v27 = vld [vmem:[%s5353_s1 + $0x110] ss:$8 sps:$4 sm:$0xff]   ;;  %v3433_v29 = vld [vmem:[%s5353_s1 + $0x104] ss:$8 sps:$4 sm:$0xff]  }
   0xb   :  { %2198 = vmatpush1.bf16.msra.mxu0 %v3405_v10  ;;  %v3435_v30 = vld [vmem:[%s5353_s1] ss:$8 sps:$4 sm:$0xff]   ;;  %v3437_v32 = vld [vmem:[%s5353_s1 + $0xf4] ss:$8 sps:$4 sm:$0xff]   ;;  %v3441_v34 = vld [vmem:[%s5353_s1 + $0xf0] ss:$8 sps:$4 sm:$0xff]  }
   0xc   :  { %2271 = vmatpush1.bf16.msra.mxu1 %v3406_v11  ;;  %2199 = vmatprep.subr.bf16.mxu0 %v3407_v12  ;;  %v3436_v31 = vld [vmem:[%s5353_s1 + $0x100] ss:$8 sps:$4 sm:$0xff]   ;;  %v3439_v33 = vld [vmem:[%s5353_s1 + $0x1f4] ss:$8 sps:$4 sm:$0xff]   ;;  %v3442_v35 = vld [vmem:[%s5353_s1 + $0x1f0] ss:$8 sps:$4 sm:$0xff]  }
   0xd   :  { %2272 = vmatprep.subr.bf16.mxu1 %v3409_v13  ;;  %v3443_v36 = vld [vmem:[%s5353_s1 + $0xe4] ss:$8 sps:$4 sm:$0xff]   ;;  %v3447_v38 = vld [vmem:[%s5353_s1 + $0xe0] ss:$8 sps:$4 sm:$0xff]   ;;  %v3449_v40 = vld [vmem:[%s5353_s1 + $0xd4] ss:$8 sps:$4 sm:$0xff]  }
   0xe   :  { %v3445_v37 = vld [vmem:[%s5353_s1 + $0x1e4] ss:$8 sps:$4 sm:$0xff]   ;;  %v3448_v39 = vld [vmem:[%s5353_s1 + $0x1e0] ss:$8 sps:$4 sm:$0xff]   ;;  %v3451_v41 = vld [vmem:[%s5353_s1 + $0x1d4] ss:$8 sps:$4 sm:$0xff]  }
   0xf   :  { %2200 = vmatpush1.bf16.msra.mxu0 %v3411_v14  ;;  %v3453_v42 = vld [vmem:[%s5353_s1 + $0xd0] ss:$8 sps:$4 sm:$0xff]   ;;  %v3455_v44 = vld [vmem:[%s5353_s1 + $0xc4] ss:$8 sps:$4 sm:$0xff]   ;;  %v3459_v46 = vld [vmem:[%s5353_s1 + $0xc0] ss:$8 sps:$4 sm:$0xff]  }
  0x10   :  { %2273 = vmatpush1.bf16.msra.mxu1 %v3412_v15  ;;  %2201 = vmatprep.subr.bf16.mxu0 %v3413_v16  ;;  %v3454_v43 = vld [vmem:[%s5353_s1 + $0x1d0] ss:$8 sps:$4 sm:$0xff]   ;;  %v3457_v45 = vld [vmem:[%s5353_s1 + $0x1c4] ss:$8 sps:$4 sm:$0xff]   ;;  %v3460_v47 = vld [vmem:[%s5353_s1 + $0x1c0] ss:$8 sps:$4 sm:$0xff]  }
  0x11   :  { %2274 = vmatprep.subr.bf16.mxu1 %v3415_v17  ;;  %v3461_v48 = vld [vmem:[%s5353_s1 + $0xb4] ss:$8 sps:$4 sm:$0xff]   ;;  %v3487_v49 = vld [vmem:[%s5354_s0 + $0x4] ss:$72 sps:$4 sm:$0xff]   ;;  %v3465_v52 = vld [vmem:[%s5353_s1 + $0xb0] ss:$8 sps:$4 sm:$0xff]  }
  0x12   :  { %v3463_v50 = vld [vmem:[%s5353_s1 + $0x1b4] ss:$8 sps:$4 sm:$0xff]   ;;  %2225 = vmatprep.mubr.bf16.mxu0 %v3487_v49  ;;  %v3466_v53 = vld [vmem:[%s5353_s1 + $0x1b0] ss:$8 sps:$4 sm:$0xff]   ;;  %v3467_v54 = vld [vmem:[%s5353_s1 + $0xa4] ss:$8 sps:$4 sm:$0xff]  }
  0x13   :  { %2202 = vmatpush1.bf16.msra.mxu0 %v3417_v18  ;;  %v3490_v51 = vld [vmem:[%s5354_s0 + $0xc] ss:$72 sps:$4 sm:$0xff]   ;;  %v3471_v56 = vld [vmem:[%s5353_s1 + $0xa0] ss:$8 sps:$4 sm:$0xff]   ;;  %v3477_v60 = vld [vmem:[%s5353_s1 + $0x90] ss:$8 sps:$4 sm:$0xff]  }
  0x14   :  { %2275 = vmatpush1.bf16.msra.mxu1 %v3418_v19  ;;  %2203 = vmatprep.subr.bf16.mxu0 %v3419_v20  ;;  %v3469_v55 = vld [vmem:[%s5353_s1 + $0x1a4] ss:$8 sps:$4 sm:$0xff]   ;;  %v3472_v57 = vld [vmem:[%s5353_s1 + $0x1a0] ss:$8 sps:$4 sm:$0xff]   ;;  %v3473_v58 = vld [vmem:[%s5353_s1 + $0x94] ss:$8 sps:$4 sm:$0xff]  }
  0x15   :  { %2276 = vmatprep.subr.bf16.mxu1 %v3421_v21  ;;  %2298 = vmatprep.mubr.bf16.mxu1 %v3490_v51  ;;  %v3475_v59 = vld [vmem:[%s5353_s1 + $0x194] ss:$8 sps:$4 sm:$0xff]   ;;  %v3478_v61 = vld [vmem:[%s5353_s1 + $0x190] ss:$8 sps:$4 sm:$0xff]   ;;  %v3479_v62 = vld [vmem:[%s5353_s1 + $0x84] ss:$8 sps:$4 sm:$0xff]  }
  0x16   :  { %v3481_v63 = vld [vmem:[%s5353_s1 + $0x184] ss:$8 sps:$4 sm:$0xff]   ;;  %v3483_v0 = vld [vmem:[%s5353_s1 + $0x80] ss:$8 sps:$4 sm:$0xff]   ;;  %v3493_v2 = vld [vmem:[%s5353_s1 + $0x274] ss:$8 sps:$4 sm:$0xff]  }
  0x17   :  { %2204 = vmatpush1.bf16.msra.mxu0 %v3423_v22  ;;  %v3484_v1 = vld [vmem:[%s5353_s1 + $0x180] ss:$8 sps:$4 sm:$0xff]   ;;  %v3496_v3 = vld [vmem:[%s5353_s1 + $0x374] ss:$8 sps:$4 sm:$0xff]   ;;  %v3491_v6 = vld [vmem:[%s5353_s1 + $0x270] ss:$8 sps:$4 sm:$0xff]  }
  0x18   :  { %2277 = vmatpush1.bf16.msra.mxu1 %v3424_v23  ;;  %2205 = vmatprep.subr.bf16.mxu0 %v3425_v24  ;;  %v3485_v4 = vld [vmem:[%s5354_s0] ss:$72 sps:$4 sm:$0xff]   ;;  %v3494_v7 = vld [vmem:[%s5353_s1 + $0x370] ss:$8 sps:$4 sm:$0xff]   ;;  %v3499_v8 = vld [vmem:[%s5353_s1 + $0x264] ss:$8 sps:$4 sm:$0xff]  }
  0x19   :  { %2278 = vmatprep.subr.bf16.mxu1 %v3427_v25  ;;  %v3488_v5 = vld [vmem:[%s5354_s0 + $0x8] ss:$72 sps:$4 sm:$0xff]   ;;  %v3502_v9 = vld [vmem:[%s5353_s1 + $0x364] ss:$8 sps:$4 sm:$0xff]   ;;  %v3539_v11 = vld [vmem:[%s5354_s0 + $0x94] ss:$72 sps:$4 sm:$0xff]  }
  0x1a   :  { %v3497_v10 = vld [vmem:[%s5353_s1 + $0x260] ss:$8 sps:$4 sm:$0xff]   ;;  %v3505_v13 = vld [vmem:[%s5353_s1 + $0x254] ss:$8 sps:$4 sm:$0xff]   ;;  %v3503_v15 = vld [vmem:[%s5353_s1 + $0x250] ss:$8 sps:$4 sm:$0xff]  }
  0x1b   :  { %2206 = vmatpush1.bf16.msra.mxu0 %v3429_v26  ;;  %v3500_v12 = vld [vmem:[%s5353_s1 + $0x360] ss:$8 sps:$4 sm:$0xff]   ;;  %v3508_v14 = vld [vmem:[%s5353_s1 + $0x354] ss:$8 sps:$4 sm:$0xff]   ;;  %v3506_v16 = vld [vmem:[%s5353_s1 + $0x350] ss:$8 sps:$4 sm:$0xff]  }
  0x1c   :  { %2279 = vmatpush1.bf16.msra.mxu1 %v3430_v27  ;;  %2207 = vmatprep.subr.bf16.mxu0 %v3431_v28  ;;  %v3547_v17 = vld [vmem:[%s5354_s0 + $0x90] ss:$72 sps:$4 sm:$0xff]   ;;  %v3548_v18 = vld [vmem:[%s5354_s0 + $0x9c] ss:$72 sps:$4 sm:$0xff]   ;;  %v3509_v22 = vld [vmem:[%s5353_s1 + $0x240] ss:$8 sps:$4 sm:$0xff]  }
  0x1d   :  { %2280 = vmatprep.subr.bf16.mxu1 %v3433_v29  ;;  %v3550_v19 = vld [vmem:[%s5354_s0 + $0x98] ss:$72 sps:$4 sm:$0xff]   ;;  %v3511_v20 = vld [vmem:[%s5353_s1 + $0x244] ss:$8 sps:$4 sm:$0xff]   ;;  %v3517_v25 = vld [vmem:[%s5353_s1 + $0x234] ss:$8 sps:$4 sm:$0xff]  }
  0x1e   :  { %v3514_v21 = vld [vmem:[%s5353_s1 + $0x344] ss:$8 sps:$4 sm:$0xff]   ;;  %v3512_v24 = vld [vmem:[%s5353_s1 + $0x340] ss:$8 sps:$4 sm:$0xff]   ;;  %v3520_v26 = vld [vmem:[%s5353_s1 + $0x334] ss:$8 sps:$4 sm:$0xff]  }
  0x1f   :  { %2208 = vmatpush1.bf16.msra.mxu0 %v3435_v30  ;;  %v3557_v23 = vld [vmem:[%s5354_s0 + $0x124] ss:$72 sps:$4 sm:$0xff]   ;;  %v3515_v27 = vld [vmem:[%s5353_s1 + $0x230] ss:$8 sps:$4 sm:$0xff]   ;;  %v3565_v29 = vld [vmem:[%s5354_s0 + $0x120] ss:$72 sps:$4 sm:$0xff]  }
  0x20   :  { %2281 = vmatpush1.bf16.msra.mxu1 %v3436_v31  ;;  %2209 = vmatprep.subr.bf16.mxu0 %v3437_v32  ;;  %v3518_v28 = vld [vmem:[%s5353_s1 + $0x330] ss:$8 sps:$4 sm:$0xff]   ;;  %v3566_v30 = vld [vmem:[%s5354_s0 + $0x12c] ss:$72 sps:$4 sm:$0xff]  }
  0x21   :  { %2282 = vmatprep.subr.bf16.mxu1 %v3439_v33  ;;  %v3568_v31 = vld [vmem:[%s5354_s0 + $0x128] ss:$72 sps:$4 sm:$0xff]   ;;  %v3523_v32 = vld [vmem:[%s5353_s1 + $0x224] ss:$8 sps:$4 sm:$0xff]   ;;  %v3546_v49 = vld [vmem:[%s5353_s1 + $0x3f4] ss:$8 sps:$4 sm:$0xff]  }
  0x22   :  { %v3526_v33 = vld [vmem:[%s5353_s1 + $0x324] ss:$8 sps:$4 sm:$0xff]   ;;  %v3544_v51 = vld [vmem:[%s5353_s1 + $0x3f0] ss:$8 sps:$4 sm:$0xff]  }
  0x23   :  { %2210 = vmatpush2.bf16.msra.mxu0 %v3441_v34  ;;  %v3521_v34 = vld [vmem:[%s5353_s1 + $0x220] ss:$8 sps:$4 sm:$0xff]  }
  0x24   :  { %2283 = vmatpush2.bf16.msra.mxu1 %v3442_v35  ;;  %2211 = vmatprep.subr.bf16.mxu0 %v3443_v36  ;;  %v3575_v35 = vld [vmem:[%s5354_s0 + $0x1b4] ss:$72 sps:$4 sm:$0xff]   ;;  %v3524_v36 = vld [vmem:[%s5353_s1 + $0x320] ss:$8 sps:$4 sm:$0xff]  }
  0x25   :  { %2284 = vmatprep.subr.bf16.mxu1 %v3445_v37  ;;  %v3529_v37 = vld [vmem:[%s5353_s1 + $0x214] ss:$8 sps:$4 sm:$0xff]  }
  0x27   :  { %2212 = vmatpush2.bf16.msra.mxu0 %v3447_v38  ;;  %v3532_v38 = vld [vmem:[%s5353_s1 + $0x314] ss:$8 sps:$4 sm:$0xff]  }
  0x28   :  { %2285 = vmatpush2.bf16.msra.mxu1 %v3448_v39  ;;  %2213 = vmatprep.subr.bf16.mxu0 %v3449_v40  ;;  %v3527_v39 = vld [vmem:[%s5353_s1 + $0x210] ss:$8 sps:$4 sm:$0xff]  }
  0x29   :  { %2286 = vmatprep.subr.bf16.mxu1 %v3451_v41  ;;  %v3530_v40 = vld [vmem:[%s5353_s1 + $0x310] ss:$8 sps:$4 sm:$0xff]  }
  0x2a   :  { %v3583_v41 = vld [vmem:[%s5354_s0 + $0x1b0] ss:$72 sps:$4 sm:$0xff]  }
  0x2b   :  { %2214 = vmatpush2.bf16.msra.mxu0 %v3453_v42  ;;  %v3584_v42 = vld [vmem:[%s5354_s0 + $0x1bc] ss:$72 sps:$4 sm:$0xff]  }
  0x2c   :  { %2287 = vmatpush2.bf16.msra.mxu1 %v3454_v43  ;;  %2215 = vmatprep.subr.bf16.mxu0 %v3455_v44  ;;  %v3586_v43 = vld [vmem:[%s5354_s0 + $0x1b8] ss:$72 sps:$4 sm:$0xff]   ;;  %v3535_v44 = vld [vmem:[%s5353_s1 + $0x204] ss:$8 sps:$4 sm:$0xff]  }
  0x2d   :  { %2288 = vmatprep.subr.bf16.mxu1 %v3457_v45  ;;  %v3538_v45 = vld [vmem:[%s5353_s1 + $0x304] ss:$8 sps:$4 sm:$0xff]  }
  0x2f   :  { %2216 = vmatpush2.bf16.msra.mxu0 %v3459_v46  ;;  %v3533_v46 = vld [vmem:[%s5353_s1 + $0x200] ss:$8 sps:$4 sm:$0xff]  }
  0x30   :  { %2289 = vmatpush2.bf16.msra.mxu1 %v3460_v47  ;;  %2217 = vmatprep.subr.bf16.mxu0 %v3461_v48  ;;  %v3536_v47 = vld [vmem:[%s5353_s1 + $0x300] ss:$8 sps:$4 sm:$0xff]   ;;  %v3543_v48 = vld [vmem:[%s5353_s1 + $0x2f4] ss:$8 sps:$4 sm:$0xff]  }
  0x31   :  { %2290 = vmatprep.subr.bf16.mxu1 %v3463_v50  ;;  %v3541_v50 = vld [vmem:[%s5353_s1 + $0x2f0] ss:$8 sps:$4 sm:$0xff]  }
  0x33   :  { %2218 = vmatpush2.bf16.msra.mxu0 %v3465_v52  ;;  %v3553_v52 = vld [vmem:[%s5353_s1 + $0x2e4] ss:$8 sps:$4 sm:$0xff]  }
  0x34   :  { %2291 = vmatpush2.bf16.msra.mxu1 %v3466_v53  ;;  %2219 = vmatprep.subr.bf16.mxu0 %v3467_v54  ;;  %v3556_v53 = vld [vmem:[%s5353_s1 + $0x3e4] ss:$8 sps:$4 sm:$0xff]   ;;  %v3607_v54 = vld [vmem:[%s5354_s0 + $0x14] ss:$72 sps:$4 sm:$0xff]  }
  0x35   :  { %2292 = vmatprep.subr.bf16.mxu1 %v3469_v55  ;;  %v3610_v55 = vld [vmem:[%s5354_s0 + $0x1c] ss:$72 sps:$4 sm:$0xff]  }
  0x37   :  { %2220 = vmatpush2.bf16.msra.mxu0 %v3471_v56  ;;  %v3551_v56 = vld [vmem:[%s5353_s1 + $0x2e0] ss:$8 sps:$4 sm:$0xff]  }
  0x38   :  { %2293 = vmatpush2.bf16.msra.mxu1 %v3472_v57  ;;  %2221 = vmatprep.subr.bf16.mxu0 %v3473_v58  ;;  %v3554_v57 = vld [vmem:[%s5353_s1 + $0x3e0] ss:$8 sps:$4 sm:$0xff]   ;;  %v3561_v58 = vld [vmem:[%s5353_s1 + $0x2d4] ss:$8 sps:$4 sm:$0xff]  }
  0x39   :  { %2294 = vmatprep.subr.bf16.mxu1 %v3475_v59  ;;  %v3564_v59 = vld [vmem:[%s5353_s1 + $0x3d4] ss:$8 sps:$4 sm:$0xff]  }
  0x3b   :  { %2222 = vmatpush2.bf16.msra.mxu0 %v3477_v60  ;;  %v3559_v60 = vld [vmem:[%s5353_s1 + $0x2d0] ss:$8 sps:$4 sm:$0xff]  }
  0x3c   :  { %2295 = vmatpush2.bf16.msra.mxu1 %v3478_v61  ;;  %2223 = vmatprep.subr.bf16.mxu0 %v3479_v62  ;;  %v3562_v61 = vld [vmem:[%s5353_s1 + $0x3d0] ss:$8 sps:$4 sm:$0xff]   ;;  %v3571_v62 = vld [vmem:[%s5353_s1 + $0x2c4] ss:$8 sps:$4 sm:$0xff]  }
  0x3d   :  { %2296 = vmatprep.subr.bf16.mxu1 %v3481_v63  ;;  %v3574_v63 = vld [vmem:[%s5353_s1 + $0x3c4] ss:$8 sps:$4 sm:$0xff]  }
  0x3f   :  { %2224 = vmatpush2.bf16.msra.mxu0 %v3483_v0  ;;  %v3569_v0 = vld [vmem:[%s5353_s1 + $0x2c0] ss:$8 sps:$4 sm:$0xff]  }
  0x40   :  { %2297 = vmatpush2.bf16.msra.mxu1 %v3484_v1  ;;  %2339 = vmatprep.subr.bf16.mxu0 %v3493_v2  ;;  %v3572_v1 = vld [vmem:[%s5353_s1 + $0x3c0] ss:$8 sps:$4 sm:$0xff]   ;;  %v3579_v2 = vld [vmem:[%s5353_s1 + $0x2b4] ss:$8 sps:$4 sm:$0xff]  }
  0x41   :  { %2412 = vmatprep.subr.bf16.mxu1 %v3496_v3  ;;  %v3582_v3 = vld [vmem:[%s5353_s1 + $0x3b4] ss:$8 sps:$4 sm:$0xff]  }
  0x42   :  { %2226 = vmatmul.mubr.bf16.vlgmr.msra.gmra.mxu0 %v3485_v4  ;;  %v3577_v4 = vld [vmem:[%s5353_s1 + $0x2b0] ss:$8 sps:$4 sm:$0xff]  }
  0x43   :  { %2299 = vmatmul.mubr.bf16.vlgmr.msra.gmra.mxu1 %v3488_v5  ;;  %2340 = vmatpush1.bf16.msra.mxu0 %v3491_v6  ;;  %v3580_v5 = vld [vmem:[%s5353_s1 + $0x3b0] ss:$8 sps:$4 sm:$0xff]   ;;  %v3589_v6 = vld [vmem:[%s5353_s1 + $0x2a4] ss:$8 sps:$4 sm:$0xff]  }
  0x44   :  { %2413 = vmatpush1.bf16.msra.mxu1 %v3494_v7  ;;  %2341 = vmatprep.subr.bf16.mxu0 %v3499_v8  ;;  %v3592_v7 = vld [vmem:[%s5353_s1 + $0x3a4] ss:$8 sps:$4 sm:$0xff]   ;;  %v3587_v8 = vld [vmem:[%s5353_s1 + $0x2a0] ss:$8 sps:$4 sm:$0xff]  }
  0x45   :  { %2414 = vmatprep.subr.bf16.mxu1 %v3502_v9  ;;  %2235 = vmatprep.mubr.bf16.mxu0 %v3539_v11  ;;  %v3590_v9 = vld [vmem:[%s5353_s1 + $0x3a0] ss:$8 sps:$4 sm:$0xff]   ;;  %v3598_v11 = vld [vmem:[%s5353_s1 + $0x394] ss:$8 sps:$4 sm:$0xff]  }
  0x46   :  { %2308 = vmatprep.mubr.bf16.mxu1 %v3548_v18  ;;  %v3613_v18 = vld [vmem:[%s5353_s1 + $0x474] ss:$8 sps:$4 sm:$0xff]  }
  0x47   :  { %2342 = vmatpush1.bf16.msra.mxu0 %v3497_v10  ;;  %v3595_v10 = vld [vmem:[%s5353_s1 + $0x294] ss:$8 sps:$4 sm:$0xff]  }
  0x48   :  { %2415 = vmatpush1.bf16.msra.mxu1 %v3500_v12  ;;  %2343 = vmatprep.subr.bf16.mxu0 %v3505_v13  ;;  %v3593_v12 = vld [vmem:[%s5353_s1 + $0x290] ss:$8 sps:$4 sm:$0xff]  }
  0x49   :  { %2416 = vmatprep.subr.bf16.mxu1 %v3508_v14  ;;  %v3596_v13 = vld [vmem:[%s5353_s1 + $0x390] ss:$8 sps:$4 sm:$0xff]   ;;  %v3601_v14 = vld [vmem:[%s5353_s1 + $0x284] ss:$8 sps:$4 sm:$0xff]  }
  0x4a   :  { %2236 = vmatmul.mubr.bf16.gmra.mxu0 %v3547_v17  ;;  %v3602_v17 = vld [vmem:[%s5353_s1 + $0x380] ss:$8 sps:$4 sm:$0xff]  }
  0x4b   :  { %2309 = vmatmul.mubr.bf16.gmra.mxu1 %v3550_v19  ;;  %2344 = vmatpush1.bf16.msra.mxu0 %v3503_v15  ;;  %v3604_v15 = vld [vmem:[%s5353_s1 + $0x384] ss:$8 sps:$4 sm:$0xff]   ;;  %v3616_v19 = vld [vmem:[%s5353_s1 + $0x574] ss:$8 sps:$4 sm:$0xff]  }
  0x4c   :  { %2417 = vmatpush1.bf16.msra.mxu1 %v3506_v16  ;;  %2345 = vmatprep.subr.bf16.mxu0 %v3511_v20  ;;  %v3599_v16 = vld [vmem:[%s5353_s1 + $0x280] ss:$8 sps:$4 sm:$0xff]   ;;  %v3605_v20 = vld [vmem:[%s5354_s0 + $0x10] ss:$72 sps:$4 sm:$0xff]  }
  0x4d   :  { %2418 = vmatprep.subr.bf16.mxu1 %v3514_v21  ;;  %2245 = vmatprep.mubr.bf16.mxu0 %v3557_v23  ;;  %v3608_v21 = vld [vmem:[%s5354_s0 + $0x18] ss:$72 sps:$4 sm:$0xff]  }
  0x4e   :  { %2318 = vmatprep.mubr.bf16.mxu1 %v3566_v30  ;;  %v3614_v23 = vld [vmem:[%s5353_s1 + $0x570] ss:$8 sps:$4 sm:$0xff]   ;;  %v3628_v30 = vld [vmem:[%s5353_s1 + $0x454] ss:$8 sps:$4 sm:$0xff]  }
  0x4f   :  { %2346 = vmatpush1.bf16.msra.mxu0 %v3509_v22  ;;  %v3611_v22 = vld [vmem:[%s5353_s1 + $0x470] ss:$8 sps:$4 sm:$0xff]  }
  0x50   :  { %2419 = vmatpush1.bf16.msra.mxu1 %v3512_v24  ;;  %2347 = vmatprep.subr.bf16.mxu0 %v3517_v25  ;;  %v3619_v24 = vld [vmem:[%s5353_s1 + $0x464] ss:$8 sps:$4 sm:$0xff]  }
  0x51   :  { %2420 = vmatprep.subr.bf16.mxu1 %v3520_v26  ;;  %v3622_v25 = vld [vmem:[%s5353_s1 + $0x564] ss:$8 sps:$4 sm:$0xff]  }
  0x52   :  { %2246 = vmatmul.mubr.bf16.gmra.mxu0 %v3565_v29  ;;  %v3623_v26 = vld [vmem:[%s5354_s0 + $0xa4] ss:$72 sps:$4 sm:$0xff]   ;;  %v3620_v29 = vld [vmem:[%s5353_s1 + $0x560] ss:$8 sps:$4 sm:$0xff]  }
  0x53   :  { %2319 = vmatmul.mubr.bf16.gmra.mxu1 %v3568_v31  ;;  %2348 = vmatpush1.bf16.msra.mxu0 %v3515_v27  ;;  %v3632_v27 = vld [vmem:[%s5354_s0 + $0xac] ss:$72 sps:$4 sm:$0xff]  }
  0x54   :  { %2421 = vmatpush1.bf16.msra.mxu1 %v3518_v28  ;;  %2349 = vmatprep.subr.bf16.mxu0 %v3523_v32  ;;  %v3617_v28 = vld [vmem:[%s5353_s1 + $0x460] ss:$8 sps:$4 sm:$0xff]   ;;  %v3631_v31 = vld [vmem:[%s5353_s1 + $0x554] ss:$8 sps:$4 sm:$0xff]  }
  0x55   :  { %2422 = vmatprep.subr.bf16.mxu1 %v3526_v33  ;;  %2255 = vmatprep.mubr.bf16.mxu0 %v3575_v35  ;;  %v3625_v32 = vld [vmem:[%s5354_s0 + $0xa0] ss:$72 sps:$4 sm:$0xff]   ;;  %v3626_v33 = vld [vmem:[%s5353_s1 + $0x450] ss:$8 sps:$4 sm:$0xff]  }
  0x56   :  { %2328 = vmatprep.mubr.bf16.mxu1 %v3584_v42  ;;  %v3634_v35 = vld [vmem:[%s5354_s0 + $0xa8] ss:$72 sps:$4 sm:$0xff]   ;;  %v3646_v42 = vld [vmem:[%s5353_s1 + $0x434] ss:$8 sps:$4 sm:$0xff]  }
  0x57   :  { %2350 = vmatpush1.bf16.msra.mxu0 %v3521_v34  ;;  %v3629_v34 = vld [vmem:[%s5353_s1 + $0x550] ss:$8 sps:$4 sm:$0xff]  }
  0x58   :  { %2423 = vmatpush1.bf16.msra.mxu1 %v3524_v36  ;;  %2351 = vmatprep.subr.bf16.mxu0 %v3529_v37  ;;  %v3637_v36 = vld [vmem:[%s5353_s1 + $0x444] ss:$8 sps:$4 sm:$0xff]  }
  0x59   :  { %2424 = vmatprep.subr.bf16.mxu1 %v3532_v38  ;;  %v3640_v37 = vld [vmem:[%s5353_s1 + $0x544] ss:$8 sps:$4 sm:$0xff]   ;;  %v3641_v38 = vld [vmem:[%s5354_s0 + $0x134] ss:$72 sps:$4 sm:$0xff]  }
  0x5a   :  { %2256 = vmatmul.mubr.bf16.gmra.mxu0 %v3583_v41  ;;  %v3638_v41 = vld [vmem:[%s5353_s1 + $0x540] ss:$8 sps:$4 sm:$0xff]  }
  0x5b   :  { %2329 = vmatmul.mubr.bf16.gmra.mxu1 %v3586_v43  ;;  %2352 = vmatpush1.bf16.msra.mxu0 %v3527_v39  ;;  %v3650_v39 = vld [vmem:[%s5354_s0 + $0x13c] ss:$72 sps:$4 sm:$0xff]  }
  0x5c   :  { %2425 = vmatpush1.bf16.msra.mxu1 %v3530_v40  ;;  %2353 = vmatprep.subr.bf16.mxu0 %v3535_v44  ;;  %v3635_v40 = vld [vmem:[%s5353_s1 + $0x440] ss:$8 sps:$4 sm:$0xff]   ;;  %v3649_v43 = vld [vmem:[%s5353_s1 + $0x534] ss:$8 sps:$4 sm:$0xff]   ;;  %v3643_v44 = vld [vmem:[%s5354_s0 + $0x130] ss:$72 sps:$4 sm:$0xff]  }
  0x5d   :  { %2426 = vmatprep.subr.bf16.mxu1 %v3538_v45  ;;  %2371 = vmatprep.mubr.bf16.mxu0 %v3607_v54  ;;  %v3644_v45 = vld [vmem:[%s5353_s1 + $0x430] ss:$8 sps:$4 sm:$0xff]   ;;  %v3664_v54 = vld [vmem:[%s5353_s1 + $0x414] ss:$8 sps:$4 sm:$0xff]  }
  0x5e   :  { %2444 = vmatprep.mubr.bf16.mxu1 %v3610_v55  ;;  %v3667_v55 = vld [vmem:[%s5353_s1 + $0x514] ss:$8 sps:$4 sm:$0xff]  }
  0x5f   :  { %2354 = vmatpush1.bf16.msra.mxu0 %v3533_v46  ;;  %v3647_v46 = vld [vmem:[%s5353_s1 + $0x530] ss:$8 sps:$4 sm:$0xff]  }
  0x60   :  { %2427 = vmatpush1.bf16.msra.mxu1 %v3536_v47  ;;  %2355 = vmatprep.subr.bf16.mxu0 %v3543_v48  ;;  %v3652_v47 = vld [vmem:[%s5354_s0 + $0x138] ss:$72 sps:$4 sm:$0xff]   ;;  %v3655_v48 = vld [vmem:[%s5353_s1 + $0x424] ss:$8 sps:$4 sm:$0xff]  }
  0x61   :  { %2428 = vmatprep.subr.bf16.mxu1 %v3546_v49  ;;  %v3658_v49 = vld [vmem:[%s5353_s1 + $0x524] ss:$8 sps:$4 sm:$0xff]  }
  0x63   :  { %2356 = vmatpush2.bf16.msra.mxu0 %v3541_v50  ;;  %v3659_v50 = vld [vmem:[%s5354_s0 + $0x1c4] ss:$72 sps:$4 sm:$0xff]  }
  0x64   :  { %2429 = vmatpush2.bf16.msra.mxu1 %v3544_v51  ;;  %2357 = vmatprep.subr.bf16.mxu0 %v3553_v52  ;;  %v3668_v51 = vld [vmem:[%s5354_s0 + $0x1cc] ss:$72 sps:$4 sm:$0xff]   ;;  %v3653_v52 = vld [vmem:[%s5353_s1 + $0x420] ss:$8 sps:$4 sm:$0xff]  }
  0x65   :  { %2430 = vmatprep.subr.bf16.mxu1 %v3556_v53  ;;  %v3656_v53 = vld [vmem:[%s5353_s1 + $0x520] ss:$8 sps:$4 sm:$0xff]  }
  0x67   :  { %2358 = vmatpush2.bf16.msra.mxu0 %v3551_v56  ;;  %v3661_v56 = vld [vmem:[%s5354_s0 + $0x1c0] ss:$72 sps:$4 sm:$0xff]  }
  0x68   :  { %2431 = vmatpush2.bf16.msra.mxu1 %v3554_v57  ;;  %2359 = vmatprep.subr.bf16.mxu0 %v3561_v58  ;;  %v3662_v57 = vld [vmem:[%s5353_s1 + $0x410] ss:$8 sps:$4 sm:$0xff]  }
  0x69   :  { %2432 = vmatprep.subr.bf16.mxu1 %v3564_v59  ;;  %v3665_v58 = vld [vmem:[%s5353_s1 + $0x510] ss:$8 sps:$4 sm:$0xff]  }
  0x6a   :  { %v3670_v59 = vld [vmem:[%s5354_s0 + $0x1c8] ss:$72 sps:$4 sm:$0xff]  }
  0x6b   :  { %2360 = vmatpush2.bf16.msra.mxu0 %v3559_v60  ;;  %v3673_v60 = vld [vmem:[%s5353_s1 + $0x404] ss:$8 sps:$4 sm:$0xff]  }
  0x6c   :  { %2433 = vmatpush2.bf16.msra.mxu1 %v3562_v61  ;;  %2361 = vmatprep.subr.bf16.mxu0 %v3571_v62  ;;  %v3676_v61 = vld [vmem:[%s5353_s1 + $0x504] ss:$8 sps:$4 sm:$0xff]  }
  0x6d   :  { %2434 = vmatprep.subr.bf16.mxu1 %v3574_v63  ;;  %v3727_v62 = vld [vmem:[%s5354_s0 + $0x24] ss:$72 sps:$4 sm:$0xff]  }
  0x6e   :  { %v3730_v63 = vld [vmem:[%s5354_s0 + $0x2c] ss:$72 sps:$4 sm:$0xff]  }
  0x6f   :  { %2362 = vmatpush2.bf16.msra.mxu0 %v3569_v0  ;;  %v3671_v0 = vld [vmem:[%s5353_s1 + $0x400] ss:$8 sps:$4 sm:$0xff]  }
  0x70   :  { %2435 = vmatpush2.bf16.msra.mxu1 %v3572_v1  ;;  %2363 = vmatprep.subr.bf16.mxu0 %v3579_v2  ;;  %v3674_v1 = vld [vmem:[%s5353_s1 + $0x500] ss:$8 sps:$4 sm:$0xff]   ;;  %v3679_v2 = vld [vmem:[%s5353_s1 + $0x4f4] ss:$8 sps:$4 sm:$0xff]  }
  0x71   :  { %2436 = vmatprep.subr.bf16.mxu1 %v3582_v3  ;;  %v3682_v3 = vld [vmem:[%s5353_s1 + $0x5f4] ss:$8 sps:$4 sm:$0xff]  }
  0x73   :  { %2364 = vmatpush2.bf16.msra.mxu0 %v3577_v4  ;;  %v3677_v4 = vld [vmem:[%s5353_s1 + $0x4f0] ss:$8 sps:$4 sm:$0xff]  }
  0x74   :  { %2437 = vmatpush2.bf16.msra.mxu1 %v3580_v5  ;;  %2365 = vmatprep.subr.bf16.mxu0 %v3589_v6  ;;  %v3680_v5 = vld [vmem:[%s5353_s1 + $0x5f0] ss:$8 sps:$4 sm:$0xff]   ;;  %v3685_v6 = vld [vmem:[%s5353_s1 + $0x4e4] ss:$8 sps:$4 sm:$0xff]  }
  0x75   :  { %2438 = vmatprep.subr.bf16.mxu1 %v3592_v7  ;;  %v3688_v7 = vld [vmem:[%s5353_s1 + $0x5e4] ss:$8 sps:$4 sm:$0xff]  }
  0x77   :  { %2366 = vmatpush2.bf16.msra.mxu0 %v3587_v8  ;;  %v3683_v8 = vld [vmem:[%s5353_s1 + $0x4e0] ss:$8 sps:$4 sm:$0xff]  }
  0x78   :  { %2439 = vmatpush2.bf16.msra.mxu1 %v3590_v9  ;;  %2367 = vmatprep.subr.bf16.mxu0 %v3595_v10  ;;  %v3686_v9 = vld [vmem:[%s5353_s1 + $0x5e0] ss:$8 sps:$4 sm:$0xff]   ;;  %v3691_v10 = vld [vmem:[%s5353_s1 + $0x4d4] ss:$8 sps:$4 sm:$0xff]  }
  0x79   :  { %2440 = vmatprep.subr.bf16.mxu1 %v3598_v11  ;;  %v3694_v11 = vld [vmem:[%s5353_s1 + $0x5d4] ss:$8 sps:$4 sm:$0xff]  }
  0x7b   :  { %2368 = vmatpush2.bf16.msra.mxu0 %v3593_v12  ;;  %v3689_v12 = vld [vmem:[%s5353_s1 + $0x4d0] ss:$8 sps:$4 sm:$0xff]  }
  0x7c   :  { %2441 = vmatpush2.bf16.msra.mxu1 %v3596_v13  ;;  %2369 = vmatprep.subr.bf16.mxu0 %v3601_v14  ;;  %v3692_v13 = vld [vmem:[%s5353_s1 + $0x5d0] ss:$8 sps:$4 sm:$0xff]   ;;  %v3697_v14 = vld [vmem:[%s5353_s1 + $0x4c4] ss:$8 sps:$4 sm:$0xff]  }
  0x7d   :  { %2442 = vmatprep.subr.bf16.mxu1 %v3604_v15  ;;  %v3700_v15 = vld [vmem:[%s5353_s1 + $0x5c4] ss:$8 sps:$4 sm:$0xff]  }
  0x7f   :  { %2370 = vmatpush2.bf16.msra.mxu0 %v3599_v16  ;;  %v3695_v16 = vld [vmem:[%s5353_s1 + $0x4c0] ss:$8 sps:$4 sm:$0xff]  }
  0x80   :  { %2443 = vmatpush2.bf16.msra.mxu1 %v3602_v17  ;;  %2485 = vmatprep.subr.bf16.mxu0 %v3613_v18  ;;  %v3698_v17 = vld [vmem:[%s5353_s1 + $0x5c0] ss:$8 sps:$4 sm:$0xff]   ;;  %v3703_v18 = vld [vmem:[%s5353_s1 + $0x4b4] ss:$8 sps:$4 sm:$0xff]  }
  0x81   :  { %2558 = vmatprep.subr.bf16.mxu1 %v3616_v19  ;;  %v3706_v19 = vld [vmem:[%s5353_s1 + $0x5b4] ss:$8 sps:$4 sm:$0xff]  }
  0x82   :  { %2372 = vmatmul.mubr.bf16.vlgmr.msra.gmra.mxu0 %v3605_v20  ;;  %v3701_v20 = vld [vmem:[%s5353_s1 + $0x4b0] ss:$8 sps:$4 sm:$0xff]  }
  0x83   :  { %2445 = vmatmul.mubr.bf16.vlgmr.msra.gmra.mxu1 %v3608_v21  ;;  %2486 = vmatpush1.bf16.msra.mxu0 %v3611_v22  ;;  %v3704_v21 = vld [vmem:[%s5353_s1 + $0x5b0] ss:$8 sps:$4 sm:$0xff]   ;;  %v3709_v22 = vld [vmem:[%s5353_s1 + $0x4a4] ss:$8 sps:$4 sm:$0xff]  }
  0x84   :  { %2559 = vmatpush1.bf16.msra.mxu1 %v3614_v23  ;;  %2487 = vmatprep.subr.bf16.mxu0 %v3619_v24  ;;  %v3712_v23 = vld [vmem:[%s5353_s1 + $0x5a4] ss:$8 sps:$4 sm:$0xff]   ;;  %v3707_v24 = vld [vmem:[%s5353_s1 + $0x4a0] ss:$8 sps:$4 sm:$0xff]  }
  0x85   :  { %2560 = vmatprep.subr.bf16.mxu1 %v3622_v25  ;;  %2381 = vmatprep.mubr.bf16.mxu0 %v3623_v26  ;;  %v3710_v25 = vld [vmem:[%s5353_s1 + $0x5a0] ss:$8 sps:$4 sm:$0xff]   ;;  %v3715_v26 = vld [vmem:[%s5353_s1 + $0x494] ss:$8 sps:$4 sm:$0xff]  }
  0x86   :  { %2454 = vmatprep.mubr.bf16.mxu1 %v3632_v27  ;;  %v3718_v27 = vld [vmem:[%s5353_s1 + $0x594] ss:$8 sps:$4 sm:$0xff]  }
  0x87   :  { %2488 = vmatpush1.bf16.msra.mxu0 %v3617_v28  ;;  %v3713_v28 = vld [vmem:[%s5353_s1 + $0x490] ss:$8 sps:$4 sm:$0xff]  }
  0x88   :  { %2561 = vmatpush1.bf16.msra.mxu1 %v3620_v29  ;;  %2489 = vmatprep.subr.bf16.mxu0 %v3628_v30  ;;  %v3716_v29 = vld [vmem:[%s5353_s1 + $0x590] ss:$8 sps:$4 sm:$0xff]   ;;  %v3721_v30 = vld [vmem:[%s5353_s1 + $0x484] ss:$8 sps:$4 sm:$0xff]  }
  0x89   :  { %2562 = vmatprep.subr.bf16.mxu1 %v3631_v31  ;;  %v3724_v31 = vld [vmem:[%s5353_s1 + $0x584] ss:$8 sps:$4 sm:$0xff]  }
  0x8a   :  { %2382 = vmatmul.mubr.bf16.gmra.mxu0 %v3625_v32  ;;  %v3719_v32 = vld [vmem:[%s5353_s1 + $0x480] ss:$8 sps:$4 sm:$0xff]  }
  0x8b   :  { %2455 = vmatmul.mubr.bf16.gmra.mxu1 %v3634_v35  ;;  %2490 = vmatpush1.bf16.msra.mxu0 %v3626_v33  ;;  %v3722_v33 = vld [vmem:[%s5353_s1 + $0x580] ss:$8 sps:$4 sm:$0xff]   ;;  %v3736_v35 = vld [vmem:[%s5353_s1 + $0x774] ss:$8 sps:$4 sm:$0xff]  }
  0x8c   :  { %2563 = vmatpush1.bf16.msra.mxu1 %v3629_v34  ;;  %2491 = vmatprep.subr.bf16.mxu0 %v3637_v36  ;;  %v3733_v34 = vld [vmem:[%s5353_s1 + $0x674] ss:$8 sps:$4 sm:$0xff]   ;;  %v3725_v36 = vld [vmem:[%s5354_s0 + $0x20] ss:$72 sps:$4 sm:$0xff]  }
  0x8d   :  { %2564 = vmatprep.subr.bf16.mxu1 %v3640_v37  ;;  %2391 = vmatprep.mubr.bf16.mxu0 %v3641_v38  ;;  %v3728_v37 = vld [vmem:[%s5354_s0 + $0x28] ss:$72 sps:$4 sm:$0xff]  }
  0x8e   :  { %2464 = vmatprep.mubr.bf16.mxu1 %v3650_v39  ;;  %v3731_v38 = vld [vmem:[%s5353_s1 + $0x670] ss:$8 sps:$4 sm:$0xff]  }
  0x8f   :  { %2492 = vmatpush1.bf16.msra.mxu0 %v3635_v40  ;;  %v3734_v39 = vld [vmem:[%s5353_s1 + $0x770] ss:$8 sps:$4 sm:$0xff]   ;;  %v3739_v40 = vld [vmem:[%s5353_s1 + $0x664] ss:$8 sps:$4 sm:$0xff]  }
  0x90   :  { %2565 = vmatpush1.bf16.msra.mxu1 %v3638_v41  ;;  %2493 = vmatprep.subr.bf16.mxu0 %v3646_v42  ;;  %v3742_v41 = vld [vmem:[%s5353_s1 + $0x764] ss:$8 sps:$4 sm:$0xff]   ;;  %v3743_v42 = vld [vmem:[%s5354_s0 + $0xb4] ss:$72 sps:$4 sm:$0xff]  }
  0x91   :  { %2566 = vmatprep.subr.bf16.mxu1 %v3649_v43  ;;  %v3752_v43 = vld [vmem:[%s5354_s0 + $0xbc] ss:$72 sps:$4 sm:$0xff]  }
  0x92   :  { %2392 = vmatmul.mubr.bf16.gmra.mxu0 %v3643_v44  ;;  %v3737_v44 = vld [vmem:[%s5353_s1 + $0x660] ss:$8 sps:$4 sm:$0xff]  }
  0x93   :  { %2465 = vmatmul.mubr.bf16.gmra.mxu1 %v3652_v47  ;;  %2494 = vmatpush1.bf16.msra.mxu0 %v3644_v45  ;;  %v3740_v45 = vld [vmem:[%s5353_s1 + $0x760] ss:$8 sps:$4 sm:$0xff]   ;;  %v3751_v47 = vld [vmem:[%s5353_s1 + $0x754] ss:$8 sps:$4 sm:$0xff]  }
  0x94   :  { %2567 = vmatpush1.bf16.msra.mxu1 %v3647_v46  ;;  %2495 = vmatprep.subr.bf16.mxu0 %v3655_v48  ;;  %v3748_v46 = vld [vmem:[%s5353_s1 + $0x654] ss:$8 sps:$4 sm:$0xff]   ;;  %v3745_v48 = vld [vmem:[%s5354_s0 + $0xb0] ss:$72 sps:$4 sm:$0xff]  }
  0x95   :  { %2568 = vmatprep.subr.bf16.mxu1 %v3658_v49  ;;  %2401 = vmatprep.mubr.bf16.mxu0 %v3659_v50  ;;  %v3746_v49 = vld [vmem:[%s5353_s1 + $0x650] ss:$8 sps:$4 sm:$0xff]  }
  0x96   :  { %2474 = vmatprep.mubr.bf16.mxu1 %v3668_v51  ;;  %v3749_v50 = vld [vmem:[%s5353_s1 + $0x750] ss:$8 sps:$4 sm:$0xff]  }
  0x97   :  { %2496 = vmatpush1.bf16.msra.mxu0 %v3653_v52  ;;  %v3754_v51 = vld [vmem:[%s5354_s0 + $0xb8] ss:$72 sps:$4 sm:$0xff]   ;;  %v3757_v52 = vld [vmem:[%s5353_s1 + $0x644] ss:$8 sps:$4 sm:$0xff]  }
  0x98   :  { %2569 = vmatpush1.bf16.msra.mxu1 %v3656_v53  ;;  %2497 = vmatprep.subr.bf16.mxu0 %v3664_v54  ;;  %v3760_v53 = vld [vmem:[%s5353_s1 + $0x744] ss:$8 sps:$4 sm:$0xff]  }
  0x99   :  { %2570 = vmatprep.subr.bf16.mxu1 %v3667_v55  ;;  %v3761_v54 = vld [vmem:[%s5354_s0 + $0x144] ss:$72 sps:$4 sm:$0xff]  }
  0x9a   :  { %2402 = vmatmul.mubr.bf16.gmra.mxu0 %v3661_v56  ;;  %v3770_v55 = vld [vmem:[%s5354_s0 + $0x14c] ss:$72 sps:$4 sm:$0xff]   ;;  %v3755_v56 = vld [vmem:[%s5353_s1 + $0x640] ss:$8 sps:$4 sm:$0xff]  }
  0x9b   :  { %2475 = vmatmul.mubr.bf16.gmra.mxu1 %v3670_v59  ;;  %2498 = vmatpush1.bf16.msra.mxu0 %v3662_v57  ;;  %v3758_v57 = vld [vmem:[%s5353_s1 + $0x740] ss:$8 sps:$4 sm:$0xff]   ;;  %v3769_v59 = vld [vmem:[%s5353_s1 + $0x734] ss:$8 sps:$4 sm:$0xff]  }
  0x9c   :  { %2571 = vmatpush1.bf16.msra.mxu1 %v3665_v58  ;;  %2499 = vmatprep.subr.bf16.mxu0 %v3673_v60  ;;  %v3766_v58 = vld [vmem:[%s5353_s1 + $0x634] ss:$8 sps:$4 sm:$0xff]   ;;  %v3763_v60 = vld [vmem:[%s5354_s0 + $0x140] ss:$72 sps:$4 sm:$0xff]  }
  0x9d   :  { %2572 = vmatprep.subr.bf16.mxu1 %v3676_v61  ;;  %2517 = vmatprep.mubr.bf16.mxu0 %v3727_v62  ;;  %v3764_v61 = vld [vmem:[%s5353_s1 + $0x630] ss:$8 sps:$4 sm:$0xff]  }
  0x9e   :  { %2590 = vmatprep.mubr.bf16.mxu1 %v3730_v63  ;;  %v3772_v62 = vld [vmem:[%s5354_s0 + $0x148] ss:$72 sps:$4 sm:$0xff]  }
  0x9f   :  { %2500 = vmatpush1.bf16.msra.mxu0 %v3671_v0  ;;  %v3767_v63 = vld [vmem:[%s5353_s1 + $0x730] ss:$8 sps:$4 sm:$0xff]   ;;  %v3775_v0 = vld [vmem:[%s5353_s1 + $0x624] ss:$8 sps:$4 sm:$0xff]  }
  0xa0   :  { %2573 = vmatpush1.bf16.msra.mxu1 %v3674_v1  ;;  %2501 = vmatprep.subr.bf16.mxu0 %v3679_v2  ;;  %v3778_v1 = vld [vmem:[%s5353_s1 + $0x724] ss:$8 sps:$4 sm:$0xff]   ;;  %v3779_v2 = vld [vmem:[%s5354_s0 + $0x1d4] ss:$72 sps:$4 sm:$0xff]  }
  0xa1   :  { %2574 = vmatprep.subr.bf16.mxu1 %v3682_v3  ;;  %v3788_v3 = vld [vmem:[%s5354_s0 + $0x1dc] ss:$72 sps:$4 sm:$0xff]  }
  0xa3   :  { %2502 = vmatpush2.bf16.msra.mxu0 %v3677_v4  ;;  %v3773_v4 = vld [vmem:[%s5353_s1 + $0x620] ss:$8 sps:$4 sm:$0xff]  }
  0xa4   :  { %2575 = vmatpush2.bf16.msra.mxu1 %v3680_v5  ;;  %2503 = vmatprep.subr.bf16.mxu0 %v3685_v6  ;;  %v3776_v5 = vld [vmem:[%s5353_s1 + $0x720] ss:$8 sps:$4 sm:$0xff]   ;;  %v3784_v6 = vld [vmem:[%s5353_s1 + $0x614] ss:$8 sps:$4 sm:$0xff]  }
  0xa5   :  { %2576 = vmatprep.subr.bf16.mxu1 %v3688_v7  ;;  %v3787_v7 = vld [vmem:[%s5353_s1 + $0x714] ss:$8 sps:$4 sm:$0xff]  }
  0xa7   :  { %2504 = vmatpush2.bf16.msra.mxu0 %v3683_v8  ;;  %v3781_v8 = vld [vmem:[%s5354_s0 + $0x1d0] ss:$72 sps:$4 sm:$0xff]  }
  0xa8   :  { %2577 = vmatpush2.bf16.msra.mxu1 %v3686_v9  ;;  %2505 = vmatprep.subr.bf16.mxu0 %v3691_v10  ;;  %v3782_v9 = vld [vmem:[%s5353_s1 + $0x610] ss:$8 sps:$4 sm:$0xff]  }
  0xa9   :  { %2578 = vmatprep.subr.bf16.mxu1 %v3694_v11  ;;  %v3790_v10 = vld [vmem:[%s5354_s0 + $0x1d8] ss:$72 sps:$4 sm:$0xff]  }
  0xaa   :  { %v3785_v11 = vld [vmem:[%s5353_s1 + $0x710] ss:$8 sps:$4 sm:$0xff]  }
  0xab   :  { %2506 = vmatpush2.bf16.msra.mxu0 %v3689_v12  ;;  %v3793_v12 = vld [vmem:[%s5353_s1 + $0x604] ss:$8 sps:$4 sm:$0xff]  }
  0xac   :  { %2579 = vmatpush2.bf16.msra.mxu1 %v3692_v13  ;;  %2507 = vmatprep.subr.bf16.mxu0 %v3697_v14  ;;  %v3796_v13 = vld [vmem:[%s5353_s1 + $0x704] ss:$8 sps:$4 sm:$0xff]   ;;  %v3847_v14 = vld [vmem:[%s5354_s0 + $0x34] ss:$72 sps:$4 sm:$0xff]  }
  0xad   :  { %2580 = vmatprep.subr.bf16.mxu1 %v3700_v15  ;;  %v3850_v15 = vld [vmem:[%s5354_s0 + $0x3c] ss:$72 sps:$4 sm:$0xff]  }
  0xaf   :  { %2508 = vmatpush2.bf16.msra.mxu0 %v3695_v16  ;;  %v3791_v16 = vld [vmem:[%s5353_s1 + $0x600] ss:$8 sps:$4 sm:$0xff]  }
  0xb0   :  { %2581 = vmatpush2.bf16.msra.mxu1 %v3698_v17  ;;  %2509 = vmatprep.subr.bf16.mxu0 %v3703_v18  ;;  %v3794_v17 = vld [vmem:[%s5353_s1 + $0x700] ss:$8 sps:$4 sm:$0xff]   ;;  %v3799_v18 = vld [vmem:[%s5353_s1 + $0x6f4] ss:$8 sps:$4 sm:$0xff]  }
  0xb1   :  { %2582 = vmatprep.subr.bf16.mxu1 %v3706_v19  ;;  %v3802_v19 = vld [vmem:[%s5353_s1 + $0x7f4] ss:$8 sps:$4 sm:$0xff]  }
  0xb3   :  { %2510 = vmatpush2.bf16.msra.mxu0 %v3701_v20  ;;  %v3797_v20 = vld [vmem:[%s5353_s1 + $0x6f0] ss:$8 sps:$4 sm:$0xff]  }
  0xb4   :  { %2583 = vmatpush2.bf16.msra.mxu1 %v3704_v21  ;;  %2511 = vmatprep.subr.bf16.mxu0 %v3709_v22  ;;  %v3800_v21 = vld [vmem:[%s5353_s1 + $0x7f0] ss:$8 sps:$4 sm:$0xff]   ;;  %v3805_v22 = vld [vmem:[%s5353_s1 + $0x6e4] ss:$8 sps:$4 sm:$0xff]  }
  0xb5   :  { %2584 = vmatprep.subr.bf16.mxu1 %v3712_v23  ;;  %v3808_v23 = vld [vmem:[%s5353_s1 + $0x7e4] ss:$8 sps:$4 sm:$0xff]  }
  0xb7   :  { %2512 = vmatpush2.bf16.msra.mxu0 %v3707_v24  ;;  %v3803_v24 = vld [vmem:[%s5353_s1 + $0x6e0] ss:$8 sps:$4 sm:$0xff]  }
  0xb8   :  { %2585 = vmatpush2.bf16.msra.mxu1 %v3710_v25  ;;  %2513 = vmatprep.subr.bf16.mxu0 %v3715_v26  ;;  %v3806_v25 = vld [vmem:[%s5353_s1 + $0x7e0] ss:$8 sps:$4 sm:$0xff]   ;;  %v3811_v26 = vld [vmem:[%s5353_s1 + $0x6d4] ss:$8 sps:$4 sm:$0xff]  }
  0xb9   :  { %2586 = vmatprep.subr.bf16.mxu1 %v3718_v27  ;;  %v3814_v27 = vld [vmem:[%s5353_s1 + $0x7d4] ss:$8 sps:$4 sm:$0xff]  }
  0xbb   :  { %2514 = vmatpush2.bf16.msra.mxu0 %v3713_v28  ;;  %v3809_v28 = vld [vmem:[%s5353_s1 + $0x6d0] ss:$8 sps:$4 sm:$0xff]  }
  0xbc   :  { %2587 = vmatpush2.bf16.msra.mxu1 %v3716_v29  ;;  %2515 = vmatprep.subr.bf16.mxu0 %v3721_v30  ;;  %v3812_v29 = vld [vmem:[%s5353_s1 + $0x7d0] ss:$8 sps:$4 sm:$0xff]   ;;  %v3817_v30 = vld [vmem:[%s5353_s1 + $0x6c4] ss:$8 sps:$4 sm:$0xff]  }
  0xbd   :  { %2588 = vmatprep.subr.bf16.mxu1 %v3724_v31  ;;  %v3820_v31 = vld [vmem:[%s5353_s1 + $0x7c4] ss:$8 sps:$4 sm:$0xff]  }
  0xbf   :  { %2516 = vmatpush2.bf16.msra.mxu0 %v3719_v32  ;;  %v3815_v32 = vld [vmem:[%s5353_s1 + $0x6c0] ss:$8 sps:$4 sm:$0xff]  }
  0xc0   :  { %2589 = vmatpush2.bf16.msra.mxu1 %v3722_v33  ;;  %2631 = vmatprep.subr.bf16.mxu0 %v3733_v34  ;;  %v3818_v33 = vld [vmem:[%s5353_s1 + $0x7c0] ss:$8 sps:$4 sm:$0xff]   ;;  %v3823_v34 = vld [vmem:[%s5353_s1 + $0x6b4] ss:$8 sps:$4 sm:$0xff]  }
  0xc1   :  { %2704 = vmatprep.subr.bf16.mxu1 %v3736_v35  ;;  %v3826_v35 = vld [vmem:[%s5353_s1 + $0x7b4] ss:$8 sps:$4 sm:$0xff]  }
  0xc2   :  { %2518 = vmatmul.mubr.bf16.vlgmr.msra.gmra.mxu0 %v3725_v36  ;;  %v3821_v36 = vld [vmem:[%s5353_s1 + $0x6b0] ss:$8 sps:$4 sm:$0xff]  }
  0xc3   :  { %2591 = vmatmul.mubr.bf16.vlgmr.msra.gmra.mxu1 %v3728_v37  ;;  %2632 = vmatpush1.bf16.msra.mxu0 %v3731_v38  ;;  %v3824_v37 = vld [vmem:[%s5353_s1 + $0x7b0] ss:$8 sps:$4 sm:$0xff]   ;;  %v3829_v38 = vld [vmem:[%s5353_s1 + $0x6a4] ss:$8 sps:$4 sm:$0xff]  }
  0xc4   :  { %2705 = vmatpush1.bf16.msra.mxu1 %v3734_v39  ;;  %2633 = vmatprep.subr.bf16.mxu0 %v3739_v40  ;;  %v3832_v39 = vld [vmem:[%s5353_s1 + $0x7a4] ss:$8 sps:$4 sm:$0xff]   ;;  %v3827_v40 = vld [vmem:[%s5353_s1 + $0x6a0] ss:$8 sps:$4 sm:$0xff]  }
  0xc5   :  { %2706 = vmatprep.subr.bf16.mxu1 %v3742_v41  ;;  %2527 = vmatprep.mubr.bf16.mxu0 %v3743_v42  ;;  %v3830_v41 = vld [vmem:[%s5353_s1 + $0x7a0] ss:$8 sps:$4 sm:$0xff]   ;;  %v383_v42 = vlaneseq }
  0xc6   :  { %2600 = vmatprep.mubr.bf16.mxu1 %v3752_v43  ;;  %v3835_v43 = vld [vmem:[%s5353_s1 + $0x694] ss:$8 sps:$4 sm:$0xff]  }
  0xc7   :  { %2634 = vmatpush1.bf16.msra.mxu0 %v3737_v44  ;;  %v3838_v44 = vld [vmem:[%s5353_s1 + $0x794] ss:$8 sps:$4 sm:$0xff]  }
  0xc8   :  { %2707 = vmatpush1.bf16.msra.mxu1 %v3740_v45  ;;  %2635 = vmatprep.subr.bf16.mxu0 %v3748_v46  ;;  %v3833_v45 = vld [vmem:[%s5353_s1 + $0x690] ss:$8 sps:$4 sm:$0xff]  }
  0xc9   :  { %2708 = vmatprep.subr.bf16.mxu1 %v3751_v47  ;;  %v3836_v46 = vld [vmem:[%s5353_s1 + $0x790] ss:$8 sps:$4 sm:$0xff]   ;;  %v4897_v47 = vshrl.u32 %v383_v42, 7 }
  0xca   :  { %2528 = vmatmul.mubr.bf16.gmra.mxu0 %v3745_v48  ;;  %v3841_v48 = vld [vmem:[%s5353_s1 + $0x684] ss:$8 sps:$4 sm:$0xff]  }
  0xcb   :  { %2601 = vmatmul.mubr.bf16.gmra.mxu1 %v3754_v51  ;;  %2636 = vmatpush1.bf16.msra.mxu0 %v3746_v49  ;;  %v3844_v49 = vld [vmem:[%s5353_s1 + $0x784] ss:$8 sps:$4 sm:$0xff]   ;;  %v3842_v51 = vld [vmem:[%s5353_s1 + $0x780] ss:$8 sps:$4 sm:$0xff]  }
  0xcc   :  { %2709 = vmatpush1.bf16.msra.mxu1 %v3749_v50  ;;  %2637 = vmatprep.subr.bf16.mxu0 %v3757_v52  ;;  %v3839_v50 = vld [vmem:[%s5353_s1 + $0x680] ss:$8 sps:$4 sm:$0xff]   ;;  %v5360_v52 = vsub.s32 0, %v4897_v47 }
  0xcd   :  { %2710 = vmatprep.subr.bf16.mxu1 %v3760_v53  ;;  %2537 = vmatprep.mubr.bf16.mxu0 %v3761_v54  ;;  %v381_v53 = vld [vmem:[%s5355_s2] sm:$0x3]  ;;  %v3853_v54 = vld [vmem:[%s5353_s1 + $0x874] ss:$8 sps:$4 sm:$0xff]  }
  0xce   :  { %2610 = vmatprep.mubr.bf16.mxu1 %v3770_v55  ;;  %v5359_v55 = vsub.s32 1, %v4897_v47 }
  0xcf   :  { %2638 = vmatpush1.bf16.msra.mxu0 %v3755_v56  ;;  %v3845_v56 = vld [vmem:[%s5354_s0 + $0x30] ss:$72 sps:$4 sm:$0xff]  }
  0xd0   :  { %2711 = vmatpush1.bf16.msra.mxu1 %v3758_v57  ;;  %2639 = vmatprep.subr.bf16.mxu0 %v3766_v58  ;;  %v3848_v57 = vld [vmem:[%s5354_s0 + $0x38] ss:$72 sps:$4 sm:$0xff]   ;;  %v4927_v58 = vrot.slane %v381_v53, %v5360_v52 }
  0xd1   :  { %2712 = vmatprep.subr.bf16.mxu1 %v3769_v59  ;;  %v3851_v59 = vld [vmem:[%s5353_s1 + $0x870] ss:$8 sps:$4 sm:$0xff]  }
  0xd2   :  { %2538 = vmatmul.mubr.bf16.gmra.mxu0 %v3763_v60  ;;  %v3856_v60 = vld [vmem:[%s5353_s1 + $0x864] ss:$8 sps:$4 sm:$0xff]  }
  0xd3   :  { %2611 = vmatmul.mubr.bf16.gmra.mxu1 %v3772_v62  ;;  %2640 = vmatpush1.bf16.msra.mxu0 %v3764_v61  ;;  %v4937_v61 = vrot.slane %v381_v53, %v5359_v55  ;;  %v3857_v62 = vld [vmem:[%s5354_s0 + $0xc4] ss:$72 sps:$4 sm:$0xff]  }
  0xd4   :  { %2713 = vmatpush1.bf16.msra.mxu1 %v3767_v63  ;;  %2641 = vmatprep.subr.bf16.mxu0 %v3775_v0  ;;  %v3863_v63 = vld [vmem:[%s5354_s0 + $0xcc] ss:$72 sps:$4 sm:$0xff]  }
  0xd5   :  { %2714 = vmatprep.subr.bf16.mxu1 %v3778_v1  ;;  %2547 = vmatprep.mubr.bf16.mxu0 %v3779_v2 }
  0xd6   :  { %2620 = vmatprep.mubr.bf16.mxu1 %v3788_v3  ;;  %v3854_v3 = vld [vmem:[%s5353_s1 + $0x860] ss:$8 sps:$4 sm:$0xff]  }
  0xd7   :  { %2642 = vmatpush1.bf16.msra.mxu0 %v3773_v4 }
  0xd8   :  { %2715 = vmatpush1.bf16.msra.mxu1 %v3776_v5  ;;  %2643 = vmatprep.subr.bf16.mxu0 %v3784_v6  ;;  %v3862_v6 = vld [vmem:[%s5353_s1 + $0x854] ss:$8 sps:$4 sm:$0xff]  }
  0xd9   :  { %2716 = vmatprep.subr.bf16.mxu1 %v3787_v7 }
  0xda   :  { %2548 = vmatmul.mubr.bf16.gmra.mxu0 %v3781_v8 }
  0xdb   :  { %2621 = vmatmul.mubr.bf16.gmra.mxu1 %v3790_v10  ;;  %2644 = vmatpush1.bf16.msra.mxu0 %v3782_v9 }
  0xdc   :  { %2717 = vmatpush1.bf16.msra.mxu1 %v3785_v11  ;;  %2645 = vmatprep.subr.bf16.mxu0 %v3793_v12  ;;  %v3859_v11 = vld [vmem:[%s5354_s0 + $0xc0] ss:$72 sps:$4 sm:$0xff]  }
  0xdd   :  { %2718 = vmatprep.subr.bf16.mxu1 %v3796_v13  ;;  %2663 = vmatprep.mubr.bf16.mxu0 %v3847_v14  ;;  %v3865_v12 = vld [vmem:[%s5354_s0 + $0xc8] ss:$72 sps:$4 sm:$0xff]  }
  0xde   :  { %2736 = vmatprep.mubr.bf16.mxu1 %v3850_v15  ;;  %v3860_v15 = vld [vmem:[%s5353_s1 + $0x850] ss:$8 sps:$4 sm:$0xff]  }
  0xdf   :  { %2646 = vmatpush1.bf16.msra.mxu0 %v3791_v16 }
  0xe0   :  { %2719 = vmatpush1.bf16.msra.mxu1 %v3794_v17  ;;  %2647 = vmatprep.subr.bf16.mxu0 %v3799_v18  ;;  %v3868_v18 = vld [vmem:[%s5353_s1 + $0x844] ss:$8 sps:$4 sm:$0xff]  }
  0xe1   :  { %2720 = vmatprep.subr.bf16.mxu1 %v3802_v19 }
  0xe3   :  { %2648 = vmatpush2.bf16.msra.mxu0 %v3797_v20 }
  0xe4   :  { %2721 = vmatpush2.bf16.msra.mxu1 %v3800_v21  ;;  %2649 = vmatprep.subr.bf16.mxu0 %v3805_v22  ;;  %v3869_v21 = vld [vmem:[%s5354_s0 + $0x154] ss:$72 sps:$4 sm:$0xff]  }
  0xe5   :  { %2722 = vmatprep.subr.bf16.mxu1 %v3808_v23  ;;  %v3875_v22 = vld [vmem:[%s5354_s0 + $0x15c] ss:$72 sps:$4 sm:$0xff]  }
  0xe7   :  { %2650 = vmatpush2.bf16.msra.mxu0 %v3803_v24 }
  0xe8   :  { %2723 = vmatpush2.bf16.msra.mxu1 %v3806_v25  ;;  %2651 = vmatprep.subr.bf16.mxu0 %v3811_v26  ;;  %v3866_v26 = vld [vmem:[%s5353_s1 + $0x840] ss:$8 sps:$4 sm:$0xff]  }
  0xe9   :  { %2724 = vmatprep.subr.bf16.mxu1 %v3814_v27 }
  0xeb   :  { %2652 = vmatpush2.bf16.msra.mxu0 %v3809_v28  ;;  %v3874_v28 = vld [vmem:[%s5353_s1 + $0x834] ss:$8 sps:$4 sm:$0xff]  }
  0xec   :  { %2725 = vmatpush2.bf16.msra.mxu1 %v3812_v29  ;;  %2653 = vmatprep.subr.bf16.mxu0 %v3817_v30 }
  0xed   :  { %2726 = vmatprep.subr.bf16.mxu1 %v3820_v31 }
  0xef   :  { %2654 = vmatpush2.bf16.msra.mxu0 %v3815_v32 }
  0xf0   :  { %2727 = vmatpush2.bf16.msra.mxu1 %v3818_v33  ;;  %2655 = vmatprep.subr.bf16.mxu0 %v3823_v34  ;;  %v3871_v33 = vld [vmem:[%s5354_s0 + $0x150] ss:$72 sps:$4 sm:$0xff]  }
  0xf1   :  { %2728 = vmatprep.subr.bf16.mxu1 %v3826_v35  ;;  %v3877_v34 = vld [vmem:[%s5354_s0 + $0x158] ss:$72 sps:$4 sm:$0xff]  }
  0xf3   :  { %2656 = vmatpush2.bf16.msra.mxu0 %v3821_v36 }
  0xf4   :  { %2729 = vmatpush2.bf16.msra.mxu1 %v3824_v37  ;;  %2657 = vmatprep.subr.bf16.mxu0 %v3829_v38  ;;  %v3872_v37 = vld [vmem:[%s5353_s1 + $0x830] ss:$8 sps:$4 sm:$0xff]  }
  0xf5   :  { %2730 = vmatprep.subr.bf16.mxu1 %v3832_v39 }
  0xf7   :  { %2658 = vmatpush2.bf16.msra.mxu0 %v3827_v40  ;;  %v3880_v40 = vld [vmem:[%s5353_s1 + $0x824] ss:$8 sps:$4 sm:$0xff]  }
  0xf8   :  { %2731 = vmatpush2.bf16.msra.mxu1 %v3830_v41  ;;  %2659 = vmatprep.subr.bf16.mxu0 %v3835_v43  ;;  %v3881_v43 = vld [vmem:[%s5354_s0 + $0x1e4] ss:$72 sps:$4 sm:$0xff]  }
  0xf9   :  { %2732 = vmatprep.subr.bf16.mxu1 %v3838_v44  ;;  %v3887_v44 = vld [vmem:[%s5354_s0 + $0x1ec] ss:$72 sps:$4 sm:$0xff]  }
  0xfb   :  { %2660 = vmatpush2.bf16.msra.mxu0 %v3833_v45 }
  0xfc   :  { %2733 = vmatpush2.bf16.msra.mxu1 %v3836_v46  ;;  %2661 = vmatprep.subr.bf16.mxu0 %v3841_v48 }
  0xfd   :  { %2734 = vmatprep.subr.bf16.mxu1 %v3844_v49 }
  0xff   :  { %2662 = vmatpush2.bf16.msra.mxu0 %v3839_v50  ;;  %v3878_v50 = vld [vmem:[%s5353_s1 + $0x820] ss:$8 sps:$4 sm:$0xff]  }
 0x100   :  { %2735 = vmatpush2.bf16.msra.mxu1 %v3842_v51  ;;  %2777 = vmatprep.subr.bf16.mxu0 %v3853_v54 }
 0x101   :  { %3357 = vmatprep.subr.bf16.mxu1 %v3853_v54  ;;  %v3886_v54 = vld [vmem:[%s5353_s1 + $0x814] ss:$8 sps:$4 sm:$0xff]  }
 0x102   :  { %v2227_v0 = vpop.f32.mrf.mxu0  ;;  %2664 = vmatmul.mubr.bf16.vlgmr.msra.gmra.mxu0 %v3845_v56 }
 0x103   :  { %v2300_v1 = vpop.f32.mrf.mxu1  ;;  %2737 = vmatmul.mubr.bf16.vlgmr.msra.gmra.mxu1 %v3848_v57  ;;  %v2228_v2 = vadd.f32 %v2227_v0, %v4927_v58  ;;  %2778 = vmatpush1.bf16.msra.mxu0 %v3851_v59 }
 0x104   :  { %3373 = vmatpush1.bf16.msra.mxu1 %v3851_v59  ;;  %v2229_v4 = vpop.f32.mrf.mxu0  ;;  %2779 = vmatprep.subr.bf16.mxu0 %v3856_v60 }
 0x105   :  { %v2302_v5 = vpop.f32.mrf.mxu1  ;;  %3358 = vmatprep.subr.bf16.mxu1 %v3856_v60  ;;  %v4952_v7 = vadd.f32 %v2300_v1, %v2228_v2  ;;  %v2230_v8 = vadd.f32 %v2229_v4, %v4937_v61  ;;  %2673 = vmatprep.mubr.bf16.mxu0 %v3857_v62  ;;  %v3883_v62 = vld [vmem:[%s5354_s0 + $0x1e0] ss:$72 sps:$4 sm:$0xff]   ;;  %v3884_v2 = vld [vmem:[%s5353_s1 + $0x810] ss:$8 sps:$4 sm:$0xff]  }
 0x106   :  { %2746 = vmatprep.mubr.bf16.mxu1 %v3863_v63  ;;  %v2231_v9 = vpop.f32.mrf.mxu0  ;;  %v3889_v63 = vld [vmem:[%s5354_s0 + $0x1e8] ss:$72 sps:$4 sm:$0xff]  }
 0x107   :  { %v2304_v10 = vpop.f32.mrf.mxu1  ;;  %v4961_v13 = vadd.f32 %v2302_v5, %v2230_v8  ;;  %v2232_v14 = vadd.f32 %v2231_v9, %v4927_v58  ;;  %2780 = vmatpush1.bf16.msra.mxu0 %v3854_v3  ;;  %v3892_v5 = vld [vmem:[%s5353_s1 + $0x804] ss:$8 sps:$4 sm:$0xff]  }
 0x108   :  { %3374 = vmatpush1.bf16.msra.mxu1 %v3854_v3  ;;  %v2233_v16 = vpop.f32.mrf.mxu0  ;;  %2781 = vmatprep.subr.bf16.mxu0 %v3862_v6 }
 0x109   :  { %v2306_v17 = vpop.f32.mrf.mxu1  ;;  %3359 = vmatprep.subr.bf16.mxu1 %v3862_v6  ;;  %v4970_v19 = vadd.f32 %v2304_v10, %v2232_v14  ;;  %v2234_v20 = vadd.f32 %v2233_v16, %v4937_v61  ;;  %v3890_v16 = vld [vmem:[%s5353_s1 + $0x800] ss:$8 sps:$4 sm:$0xff]  }
 0x10a   :  { %2674 = vmatmul.mubr.bf16.gmra.mxu0 %v3859_v11  ;;  %v2237_v23 = vpop.f32.mrf.mxu0  ;;  %v3919_v11 = vld [vmem:[%s5354_s0 + $0x44] ss:$72 sps:$4 sm:$0xff]  }
 0x10b   :  { %2747 = vmatmul.mubr.bf16.gmra.mxu1 %v3865_v12  ;;  %v2310_v24 = vpop.f32.mrf.mxu1  ;;  %v4979_v25 = vadd.f32 %v2306_v17, %v2234_v20  ;;  %2782 = vmatpush1.bf16.msra.mxu0 %v3860_v15  ;;  %v2238_v27 = vadd.f32 %v2237_v23, %v4927_v58  ;;  %v3922_v12 = vld [vmem:[%s5354_s0 + $0x164] ss:$72 sps:$4 sm:$0xff]   ;;  %v3895_v20 = vld [vmem:[%s5353_s1 + $0x8f4] ss:$8 sps:$4 sm:$0xff]  }
 0x10c   :  { %3375 = vmatpush1.bf16.msra.mxu1 %v3860_v15  ;;  %2783 = vmatprep.subr.bf16.mxu0 %v3868_v18  ;;  %v2239_v29 = vpop.f32.mrf.mxu0 }
 0x10d   :  { %3360 = vmatprep.subr.bf16.mxu1 %v3868_v18  ;;  %v2312_v30 = vpop.f32.mrf.mxu1  ;;  %2683 = vmatprep.mubr.bf16.mxu0 %v3869_v21  ;;  %v2240_v31 = vadd.f32 %v2239_v29, %v4937_v61  ;;  %v4989_v32 = vadd.f32 %v2310_v24, %v2238_v27 }
 0x10e   :  { %2756 = vmatprep.mubr.bf16.mxu1 %v3875_v22  ;;  %v2241_v35 = vpop.f32.mrf.mxu0 }
 0x10f   :  { %v2314_v36 = vpop.f32.mrf.mxu1  ;;  %2784 = vmatpush1.bf16.msra.mxu0 %v3866_v26  ;;  %v2242_v38 = vadd.f32 %v2241_v35, %v4927_v58  ;;  %v5001_v39 = vadd.f32 %v2312_v30, %v2240_v31  ;;  %v3898_v31 = vld [vmem:[%s5353_s1 + $0x8e4] ss:$8 sps:$4 sm:$0xff]  }
 0x110   :  { %3376 = vmatpush1.bf16.msra.mxu1 %v3866_v26  ;;  %2785 = vmatprep.subr.bf16.mxu0 %v3874_v28  ;;  %v2243_v41 = vpop.f32.mrf.mxu0 }
 0x111   :  { %3361 = vmatprep.subr.bf16.mxu1 %v3874_v28  ;;  %v2316_v42 = vpop.f32.mrf.mxu1  ;;  %v2244_v45 = vadd.f32 %v2243_v41, %v4937_v61  ;;  %v5013_v46 = vadd.f32 %v2314_v36, %v2242_v38  ;;  %v3893_v28 = vld [vmem:[%s5353_s1 + $0x8f0] ss:$8 sps:$4 sm:$0xff]   ;;  %v3901_v38 = vld [vmem:[%s5353_s1 + $0x8d4] ss:$8 sps:$4 sm:$0xff]   ;;  %v3902_v41 = vld [vmem:[%s5353_s1 + $0x8c0] ss:$8 sps:$4 sm:$0xff]  }
 0x112   :  { %2684 = vmatmul.mubr.bf16.gmra.mxu0 %v3871_v33  ;;  %v2247_v48 = vpop.f32.mrf.mxu0 }
 0x113   :  { %2757 = vmatmul.mubr.bf16.gmra.mxu1 %v3877_v34  ;;  %v2320_v49 = vpop.f32.mrf.mxu1  ;;  %2786 = vmatpush1.bf16.msra.mxu0 %v3872_v37  ;;  %v2248_v51 = vadd.f32 %v2247_v48, %v4927_v58  ;;  %v5019_v53 = vadd.f32 %v2316_v42, %v2244_v45  ;;  %v3907_v42 = vld [vmem:[%s5353_s1 + $0x8b4] ss:$8 sps:$4 sm:$0xff]   ;;  %v3908_v45 = vld [vmem:[%s5353_s1 + $0x8a0] ss:$8 sps:$4 sm:$0xff]  }
 0x114   :  { %3377 = vmatpush1.bf16.msra.mxu1 %v3872_v37  ;;  %2787 = vmatprep.subr.bf16.mxu0 %v3880_v40  ;;  %v2249_v56 = vpop.f32.mrf.mxu0  ;;  %v3913_v48 = vld [vmem:[%s5353_s1 + $0x894] ss:$8 sps:$4 sm:$0xff]  }
 0x115   :  { %3362 = vmatprep.subr.bf16.mxu1 %v3880_v40  ;;  %v2322_v57 = vpop.f32.mrf.mxu1  ;;  %2693 = vmatprep.mubr.bf16.mxu0 %v3881_v43  ;;  %v2250_v59 = vadd.f32 %v2249_v56, %v4937_v61  ;;  %v5025_v60 = vadd.f32 %v2320_v49, %v2248_v51  ;;  %v3904_v40 = vld [vmem:[%s5353_s1 + $0x8c4] ss:$8 sps:$4 sm:$0xff]   ;;  %v3905_v43 = vld [vmem:[%s5353_s1 + $0x8b0] ss:$8 sps:$4 sm:$0xff]   ;;  %v3914_v51 = vld [vmem:[%s5353_s1 + $0x880] ss:$8 sps:$4 sm:$0xff]  }
 0x116   :  { %2766 = vmatprep.mubr.bf16.mxu1 %v3887_v44  ;;  %v2251_v0 = vpop.f32.mrf.mxu0  ;;  %v3910_v44 = vld [vmem:[%s5353_s1 + $0x8a4] ss:$8 sps:$4 sm:$0xff]   ;;  %v3911_v49 = vld [vmem:[%s5353_s1 + $0x890] ss:$8 sps:$4 sm:$0xff]   ;;  %v3920_v56 = vld [vmem:[%s5354_s0 + $0x160] ss:$72 sps:$4 sm:$0xff]  }
 0x117   :  { %v2324_v1 = vpop.f32.mrf.mxu1  ;;  %2788 = vmatpush1.bf16.msra.mxu0 %v3878_v50  ;;  %v2252_v3 = vadd.f32 %v2251_v0, %v4927_v58  ;;  %v5037_v4 = vadd.f32 %v2322_v57, %v2250_v59  ;;  %v3923_v57 = vld [vmem:[%s5354_s0 + $0xd4] ss:$72 sps:$4 sm:$0xff]  }
 0x118   :  { %3378 = vmatpush1.bf16.msra.mxu1 %v3878_v50  ;;  %2789 = vmatprep.subr.bf16.mxu0 %v3886_v54  ;;  %v2253_v6 = vpop.f32.mrf.mxu0  ;;  %v3916_v50 = vld [vmem:[%s5353_s1 + $0x884] ss:$8 sps:$4 sm:$0xff]   ;;  %v3925_v59 = vld [vmem:[%s5354_s0 + $0x1f4] ss:$72 sps:$4 sm:$0xff]  }
 0x119   :  { %3363 = vmatprep.subr.bf16.mxu1 %v3886_v54  ;;  %v2326_v8 = vpop.f32.mrf.mxu1  ;;  %v2254_v9 = vadd.f32 %v2253_v6, %v4937_v61  ;;  %v5043_v10 = vadd.f32 %v2324_v1, %v2252_v3  ;;  %v3917_v54 = vld [vmem:[%s5354_s0 + $0x40] ss:$72 sps:$4 sm:$0xff]  }
 0x11a   :  { %2694 = vmatmul.mubr.bf16.gmra.mxu0 %v3883_v62  ;;  %v2257_v14 = vpop.f32.mrf.mxu0 }
 0x11b   :  { %2767 = vmatmul.mubr.bf16.gmra.mxu1 %v3889_v63  ;;  %v2330_v15 = vpop.f32.mrf.mxu1  ;;  %2790 = vmatpush1.bf16.msra.mxu0 %v3884_v2  ;;  %v2258_v17 = vadd.f32 %v2257_v14, %v4927_v58  ;;  %v5055_v18 = vadd.f32 %v2326_v8, %v2254_v9  ;;  %v3927_v9 = vld [vmem:[%s5354_s0 + $0xd0] ss:$72 sps:$4 sm:$0xff]  }
 0x11c   :  { %3379 = vmatpush1.bf16.msra.mxu1 %v3884_v2  ;;  %2791 = vmatprep.subr.bf16.mxu0 %v3892_v5  ;;  %v2259_v21 = vpop.f32.mrf.mxu0 }
 0x11d   :  { %3364 = vmatprep.subr.bf16.mxu1 %v3892_v5  ;;  %v2332_v22 = vpop.f32.mrf.mxu1  ;;  %v2260_v23 = vadd.f32 %v2259_v21, %v4937_v61  ;;  %v5061_v24 = vadd.f32 %v2330_v15, %v2258_v17  ;;  %2809 = vmatprep.mubr.bf16.mxu0 %v3919_v11  ;;  %v3928_v11 = vld [vmem:[%s5354_s0 + $0x1f0] ss:$72 sps:$4 sm:$0xff]  }
 0x11e   :  { %2829 = vmatprep.mubr.bf16.mxu1 %v3922_v12  ;;  %v2261_v26 = vpop.f32.mrf.mxu0 }
 0x11f   :  { %v2334_v27 = vpop.f32.mrf.mxu1  ;;  %2792 = vmatpush1.bf16.msra.mxu0 %v3890_v16  ;;  %v2262_v29 = vadd.f32 %v2261_v26, %v4927_v58  ;;  %v5067_v30 = vadd.f32 %v2332_v22, %v2260_v23  ;;  %v3896_v58 = vld [vmem:[%s5353_s1 + $0x8e0] ss:$8 sps:$4 sm:$0xff]  }
 0x120   :  { %3380 = vmatpush1.bf16.msra.mxu1 %v3890_v16  ;;  %2793 = vmatprep.subr.bf16.mxu0 %v3895_v20  ;;  %v2263_v33 = vpop.f32.mrf.mxu0 }
 0x121   :  { %3365 = vmatprep.subr.bf16.mxu1 %v3895_v20  ;;  %v2336_v34 = vpop.f32.mrf.mxu1  ;;  %v2264_v35 = vadd.f32 %v2263_v33, %v4937_v61  ;;  %v5073_v36 = vadd.f32 %v2334_v27, %v2262_v29  ;;  %v3899_v61 = vld [vmem:[%s5353_s1 + $0x8d0] ss:$8 sps:$4 sm:$0xff]  }
 0x123   :  { %2794 = vmatpush2.bf16.msra.mxu0 %v3893_v28  ;;  %v5078_v37 = vadd.f32 %v2336_v34, %v2264_v35 }
 0x124   :  { %3381 = vmatpush2.bf16.msra.mxu1 %v3893_v28  ;;  %2795 = vmatprep.subr.bf16.mxu0 %v3898_v31 }
 0x125   :  { %3366 = vmatprep.subr.bf16.mxu1 %v3898_v31 }
 0x127   :  { %2796 = vmatpush2.bf16.msra.mxu0 %v3896_v58 }
 0x128   :  { %3382 = vmatpush2.bf16.msra.mxu1 %v3896_v58  ;;  %2797 = vmatprep.subr.bf16.mxu0 %v3901_v38 }
 0x129   :  { %3367 = vmatprep.subr.bf16.mxu1 %v3901_v38 }
 0x12b   :  { %2798 = vmatpush2.bf16.msra.mxu0 %v3899_v61 }
 0x12c   :  { %3383 = vmatpush2.bf16.msra.mxu1 %v3899_v61  ;;  %2799 = vmatprep.subr.bf16.mxu0 %v3904_v40 }
 0x12d   :  { %3368 = vmatprep.subr.bf16.mxu1 %v3904_v40 }
 0x12f   :  { %2800 = vmatpush2.bf16.msra.mxu0 %v3902_v41 }
 0x130   :  { %3384 = vmatpush2.bf16.msra.mxu1 %v3902_v41  ;;  %2801 = vmatprep.subr.bf16.mxu0 %v3907_v42 }
 0x131   :  { %3369 = vmatprep.subr.bf16.mxu1 %v3907_v42 }
 0x133   :  { %2802 = vmatpush2.bf16.msra.mxu0 %v3905_v43 }
 0x134   :  { %3385 = vmatpush2.bf16.msra.mxu1 %v3905_v43  ;;  %2803 = vmatprep.subr.bf16.mxu0 %v3910_v44 }
 0x135   :  { %3370 = vmatprep.subr.bf16.mxu1 %v3910_v44 }
 0x137   :  { %2804 = vmatpush2.bf16.msra.mxu0 %v3908_v45 }
 0x138   :  { %3386 = vmatpush2.bf16.msra.mxu1 %v3908_v45  ;;  %2805 = vmatprep.subr.bf16.mxu0 %v3913_v48 }
 0x139   :  { %3371 = vmatprep.subr.bf16.mxu1 %v3913_v48 }
 0x13b   :  { %2806 = vmatpush2.bf16.msra.mxu0 %v3911_v49 }
 0x13c   :  { %3387 = vmatpush2.bf16.msra.mxu1 %v3911_v49  ;;  %2807 = vmatprep.subr.bf16.mxu0 %v3916_v50 }
 0x13d   :  { %3372 = vmatprep.subr.bf16.mxu1 %v3916_v50 }
 0x13f   :  { %2808 = vmatpush2.bf16.msra.mxu0 %v3914_v51 }
 0x140   :  { %3388 = vmatpush2.bf16.msra.mxu1 %v3914_v51 }
 0x142   :  { %v2373_v62 = vpop.f32.mrf.mxu0  ;;  %2810 = vmatmul.mubr.bf16.vlgmr.msra.gmra.mxu0 %v3917_v54 }
 0x143   :  { %v2446_v63 = vpop.f32.mrf.mxu1  ;;  %2830 = vmatmul.mubr.bf16.vlgmr.msra.gmra.mxu1 %v3920_v56  ;;  %v2374_v0 = vadd.f32 %v2373_v62, %v4952_v7  ;;  %2819 = vmatprep.mubr.bf16.mxu0 %v3923_v57 }
 0x144   :  { %2839 = vmatprep.mubr.bf16.mxu1 %v3925_v59  ;;  %v2375_v1 = vpop.f32.mrf.mxu0 }
 0x145   :  { %v2448_v2 = vpop.f32.mrf.mxu1  ;;  %v5129_v3 = vadd.f32 %v2446_v63, %v2374_v0  ;;  %v2376_v5 = vadd.f32 %v2375_v1, %v4961_v13 }
 0x146   :  { %v2377_v6 = vpop.f32.mrf.mxu0 }
 0x147   :  { %v2450_v8 = vpop.f32.mrf.mxu1  ;;  %v5138_v12 = vadd.f32 %v2448_v2, %v2376_v5  ;;  %v2378_v7 = vadd.f32 %v2377_v6, %v4970_v19 }
 0x148   :  { %v2379_v14 = vpop.f32.mrf.mxu0 }
 0x149   :  { %v2452_v15 = vpop.f32.mrf.mxu1  ;;  %v2451_v16 = vadd.f32 %v2450_v8, %v2378_v7  ;;  %v2380_v17 = vadd.f32 %v2379_v14, %v4979_v25 }
 0x14a   :  { %v2383_v13 = vpop.f32.mrf.mxu0  ;;  %2820 = vmatmul.mubr.bf16.gmra.mxu0 %v3927_v9 }
 0x14b   :  { %2840 = vmatmul.mubr.bf16.gmra.mxu1 %v3928_v11  ;;  %v2456_v20 = vpop.f32.mrf.mxu1  ;;  %v5142_v21 = vadd.f32 %v2452_v15, %v2380_v17  ;;  %v2384_v22 = vadd.f32 %v2383_v13, %v4989_v32 }
 0x14c   :  { %v2385_v23 = vpop.f32.mrf.mxu0 }
 0x14d   :  { %v2458_v26 = vpop.f32.mrf.mxu1  ;;  %v2386_v27 = vadd.f32 %v2385_v23, %v5001_v39  ;;  %v5146_v28 = vadd.f32 %v2456_v20, %v2384_v22 }
 0x14e   :  { %v2387_v19 = vpop.f32.mrf.mxu0 }
 0x14f   :  { %v2460_v29 = vpop.f32.mrf.mxu1  ;;  %v2388_v31 = vadd.f32 %v2387_v19, %v5013_v46  ;;  %v5149_v33 = vadd.f32 %v2458_v26, %v2386_v27 }
 0x150   :  { %v2389_v25 = vpop.f32.mrf.mxu0 }
 0x151   :  { %v2462_v34 = vpop.f32.mrf.mxu1  ;;  %v2390_v35 = vadd.f32 %v2389_v25, %v5019_v53  ;;  %v5152_v58 = vadd.f32 %v2460_v29, %v2388_v31 }
 0x152   :  { %v2393_v38 = vpop.f32.mrf.mxu0 }
 0x153   :  { %v2466_v32 = vpop.f32.mrf.mxu1  ;;  %v2394_v61 = vadd.f32 %v2393_v38, %v5025_v60  ;;  %v5155_v40 = vadd.f32 %v2462_v34, %v2390_v35 }
 0x154   :  { %v2395_v39 = vpop.f32.mrf.mxu0 }
 0x155   :  { %v2468_v41 = vpop.f32.mrf.mxu1  ;;  %v2396_v42 = vadd.f32 %v2395_v39, %v5037_v4  ;;  %v5158_v43 = vadd.f32 %v2466_v32, %v2394_v61 }
 0x156   :  { %v2397_v46 = vpop.f32.mrf.mxu0 }
 0x157   :  { %v2470_v44 = vpop.f32.mrf.mxu1  ;;  %v2398_v45 = vadd.f32 %v2397_v46, %v5043_v10  ;;  %v5161_v48 = vadd.f32 %v2468_v41, %v2396_v42 }
 0x158   :  { %v2399_v53 = vpop.f32.mrf.mxu0 }
 0x159   :  { %v2472_v49 = vpop.f32.mrf.mxu1  ;;  %v2400_v50 = vadd.f32 %v2399_v53, %v5055_v18  ;;  %v5164_v51 = vadd.f32 %v2470_v44, %v2398_v45 }
 0x15a   :  { %v2403_v60 = vpop.f32.mrf.mxu0 }
 0x15b   :  { %v2476_v54 = vpop.f32.mrf.mxu1  ;;  %v2404_v56 = vadd.f32 %v2403_v60, %v5061_v24  ;;  %v5167_v57 = vadd.f32 %v2472_v49, %v2400_v50 }
 0x15c   :  { %v2405_v4 = vpop.f32.mrf.mxu0 }
 0x15d   :  { %v2478_v59 = vpop.f32.mrf.mxu1  ;;  %v2406_v62 = vadd.f32 %v2405_v4, %v5067_v30  ;;  %v5170_v63 = vadd.f32 %v2476_v54, %v2404_v56 }
 0x15e   :  { %v2407_v10 = vpop.f32.mrf.mxu0 }
 0x15f   :  { %v2480_v0 = vpop.f32.mrf.mxu1  ;;  %v2408_v1 = vadd.f32 %v2407_v10, %v5073_v36  ;;  %v5173_v2 = vadd.f32 %v2478_v59, %v2406_v62 }
 0x160   :  { %v2409_v18 = vpop.f32.mrf.mxu0 }
 0x161   :  { %v2482_v5 = vpop.f32.mrf.mxu1  ;;  %v2410_v6 = vadd.f32 %v2409_v18, %v5078_v37  ;;  %v5176_v8 = vadd.f32 %v2480_v0, %v2408_v1 }
 0x163   :  { %v5178_v24 = vadd.f32 %v2482_v5, %v2410_v6 }
 0x182   :  { %v2519_v9 = vpop.f32.mrf.mxu0 }
 0x183   :  { %v5180_v11 = vpop.f32.mrf.mxu1 }
 0x184   :  { %v2521_v30 = vpop.f32.mrf.mxu0 }
 0x185   :  { %v5182_v7 = vpop.f32.mrf.mxu1 }
 0x186   :  { %v2523_v14 = vpop.f32.mrf.mxu0 }
 0x187   :  { %v2524_v15 = vadd.f32 %v2523_v14, %v2451_v16  ;;  %v2596_v17 = vpop.f32.mrf.mxu1 }
 0x188   :  { %v2525_v13 = vpop.f32.mrf.mxu0 }
 0x189   :  { %v5184_v36 = vadd.f32 %v2596_v17, %v2524_v15  ;;  %v5186_v20 = vpop.f32.mrf.mxu1 }
 0x18a   :  { %v2529_v22 = vpop.f32.mrf.mxu0 }
 0x18b   :  { %v5188_v37 = vpop.f32.mrf.mxu1 }
 0x18c   :  { %v2531_v23 = vpop.f32.mrf.mxu0 }
 0x18d   :  { %v5190_v26 = vpop.f32.mrf.mxu1 }
 0x18e   :  { %v2533_v27 = vpop.f32.mrf.mxu0 }
 0x18f   :  { %v5192_v19 = vpop.f32.mrf.mxu1 }
 0x190   :  { %v2535_v29 = vpop.f32.mrf.mxu0 }
 0x191   :  { %v5194_v31 = vpop.f32.mrf.mxu1 }
 0x192   :  { %v2539_v25 = vpop.f32.mrf.mxu0 }
 0x193   :  { %v2612_v16 = vpop.f32.mrf.mxu1 }
 0x194   :  { %v2541_v34 = vpop.f32.mrf.mxu0 }
 0x195   :  { %v5196_v35 = vpop.f32.mrf.mxu1 }
 0x196   :  { %v2543_v38 = vpop.f32.mrf.mxu0 }
 0x197   :  { %v5198_v32 = vpop.f32.mrf.mxu1 }
 0x198   :  { %v2545_v61 = vpop.f32.mrf.mxu0 }
 0x199   :  { %v5200_v39 = vpop.f32.mrf.mxu1 }
 0x19a   :  { %v2549_v41 = vpop.f32.mrf.mxu0 }
 0x19b   :  { %v5202_v42 = vpop.f32.mrf.mxu1 }
 0x19c   :  { %v2551_v46 = vpop.f32.mrf.mxu0 }
 0x19d   :  { %v5204_v44 = vpop.f32.mrf.mxu1 }
 0x19e   :  { %5361 = vst [vmem:[#allocation3_spill] sm:$0xff] %v5204_v44  ;;  %v2553_v45 = vpop.f32.mrf.mxu0  ;;  %v2530_v44 = vadd.f32 %v2529_v22, %v5146_v28  ;;  %v5380_v28 = vsub.s32 1, %v4897_v47  ;;  %v2546_v22 = vadd.f32 %v2545_v61, %v5167_v57 }
 0x19f   :  { %v5206_v53 = vpop.f32.mrf.mxu1 }
 0x1a0   :  { %5362 = vst [vmem:[#allocation4_spill] sm:$0xff] %v5206_v53  ;;  %v2555_v49 = vpop.f32.mrf.mxu0 }
 0x1a1   :  { %v5208_v50 = vpop.f32.mrf.mxu1 }
 0x1a2   :  { %5363 = vst [vmem:[#allocation5_spill] sm:$0xff] %v5208_v50 }
 0x1c2   :  { %v2665_v60 = vpop.f32.mrf.mxu0 }
 0x1c3   :  { %v5210_v54 = vpop.f32.mrf.mxu1 }
 0x1c4   :  { %5364 = vst [vmem:[#allocation6_spill] sm:$0xff] %v5210_v54  ;;  %v2667_v56 = vpop.f32.mrf.mxu0 }
 0x1c5   :  { %v5212_v4 = vpop.f32.mrf.mxu1 }
 0x1c6   :  { %5365 = vst [vmem:[#allocation7_spill] sm:$0xff] %v5212_v4  ;;  %v2669_v59 = vpop.f32.mrf.mxu0 }
 0x1c7   :  { %v5214_v62 = vpop.f32.mrf.mxu1 }
 0x1c8   :  { %5366 = vst [vmem:[#allocation8_spill] sm:$0xff] %v5214_v62  ;;  %v2671_v10 = vpop.f32.mrf.mxu0 }
 0x1c9   :  { %v5216_v0 = vpop.f32.mrf.mxu1 }
 0x1ca   :  { %5367 = vst [vmem:[#allocation9_spill] sm:$0xff] %v5216_v0  ;;  %v2675_v1 = vpop.f32.mrf.mxu0 }
 0x1cb   :  { %v5218_v18 = vpop.f32.mrf.mxu1 }
 0x1cc   :  { %5368 = vst [vmem:[#allocation10_spill] sm:$0xff] %v5218_v18  ;;  %v2677_v5 = vpop.f32.mrf.mxu0 }
 0x1cd   :  { %v5220_v6 = vpop.f32.mrf.mxu1 }
 0x1ce   :  { %5369 = vst [vmem:[#allocation11_spill] sm:$0xff] %v5220_v6  ;;  %v5222_v14 = vpop.f32.mrf.mxu0  ;;  %v2520_v6 = vadd.f32 %v2519_v9, %v5129_v3  ;;  %v2532_v3 = vadd.f32 %v2531_v23, %v5149_v33  ;;  %v2534_v9 = vadd.f32 %v2533_v27, %v5152_v58  ;;  %v2536_v33 = vadd.f32 %v2535_v29, %v5155_v40 }
 0x1cf   :  { %5370 = vst [vmem:[#allocation12_spill] sm:$0xff] %v5222_v14  ;;  %v5224_v15 = vpop.f32.mrf.mxu1  ;;  %v2544_v58 = vadd.f32 %v2543_v38, %v5164_v51  ;;  %v2552_v27 = vadd.f32 %v2551_v46, %v5173_v2 }
 0x1d0   :  { %5371 = vst [vmem:[#allocation13_spill] sm:$0xff] %v5224_v15  ;;  %v5226_v17 = vpop.f32.mrf.mxu0 }
 0x1d1   :  { %5372 = vst [vmem:[#allocation14_spill] sm:$0xff] %v5226_v17  ;;  %v5228_v55 = vpop.f32.mrf.mxu1  ;;  %v2522_v17 = vadd.f32 %v2521_v30, %v5138_v12  ;;  %v5379_v30 = vsub.s32 0, %v4897_v47  ;;  %v2607_v47 = vadd.f32 %v5192_v19, %v2534_v9  ;;  %v2617_v2 = vadd.f32 %v5198_v32, %v2544_v58  ;;  %v5389_v9 = vld [vmem:[#allocation9_spill] sm:$0xff] }
 0x1d2   :  { %5373 = vst [vmem:[#allocation15_spill] sm:$0xff] %v5228_v55  ;;  %v2685_v52 = vpop.f32.mrf.mxu0  ;;  %v2526_v55 = vadd.f32 %v2525_v13, %v5142_v21  ;;  %v2542_v21 = vadd.f32 %v2541_v34, %v5161_v48  ;;  %v2550_v48 = vadd.f32 %v2549_v41, %v5170_v63  ;;  %v2554_v34 = vadd.f32 %v2553_v45, %v5176_v8  ;;  %v5382_v41 = vld [vmem:[#allocation4_spill] sm:$0xff] }
 0x1d3   :  { %v2758_v4 = vpop.f32.mrf.mxu1  ;;  %v2595_v12 = vadd.f32 %v5182_v7, %v2522_v17  ;;  %v2603_v7 = vadd.f32 %v5188_v37, %v2530_v44  ;;  %v2609_v63 = vadd.f32 %v5194_v31, %v2536_v33  ;;  %v2670_v19 = vadd.f32 %v2669_v59, %v5184_v36 }
 0x1d4   :  { %v2687_v62 = vpop.f32.mrf.mxu0  ;;  %v2615_v51 = vadd.f32 %v5196_v35, %v2542_v21  ;;  %v2623_v8 = vadd.f32 %v5202_v42, %v2550_v48  ;;  %v2627_v46 = vadd.f32 %v5382_v41, %v2554_v34  ;;  %v5383_v35 = vld [vmem:[#allocation5_spill] sm:$0xff]  ;;  %v5387_v42 = vld [vmem:[#allocation8_spill] sm:$0xff] }
 0x1d5   :  { %v5230_v54 = vpop.f32.mrf.mxu1  ;;  %v2668_v37 = vadd.f32 %v2667_v56, %v2595_v12  ;;  %v2676_v45 = vadd.f32 %v2675_v1, %v2603_v7  ;;  %v2743_v56 = vadd.f32 %v5387_v42, %v2670_v19  ;;  %v5392_v33 = vld [vmem:[#allocation11_spill] sm:$0xff] }
 0x1d6   :  { %5374 = vst [vmem:[#allocation16_spill] sm:$0xff] %v5230_v54  ;;  %v2689_v0 = vpop.f32.mrf.mxu0  ;;  %v2866_v54 = vld [vmem:[%s5356_s3] sm:$0x3]  ;;  %v2688_v61 = vadd.f32 %v2687_v62, %v2615_v51 }
 0x1d7   :  { %v5232_v50 = vpop.f32.mrf.mxu1  ;;  %v5257_v13 = vrot.slane %v2866_v54, %v5379_v30  ;;  %v2690_v62 = vadd.f32 %v2689_v0, %v2617_v2 }
 0x1d8   :  { %5375 = vst [vmem:[#allocation17_spill] sm:$0xff] %v5232_v50  ;;  %v2691_v18 = vpop.f32.mrf.mxu0  ;;  %v2540_v50 = vadd.f32 %v2539_v25, %v5158_v43  ;;  %v5261_v43 = vrot.slane %v2866_v54, %v5380_v28  ;;  %v2605_v25 = vadd.f32 %v5190_v26, %v2532_v3  ;;  %v2619_v26 = vadd.f32 %v5200_v39, %v2546_v22  ;;  %v5388_v59 = vld [vmem:[#allocation14_spill] sm:$0xff] }
 0x1d9   :  { %v5234_v53 = vpop.f32.mrf.mxu1  ;;  %v5391_v28 = vld [vmem:[#allocation10_spill] sm:$0xff]  ;;  %v5395_v34 = vld [vmem:[#allocation15_spill] sm:$0xff] }
 0x1da   :  { %5376 = vst [vmem:[#allocation18_spill] sm:$0xff] %v5234_v53  ;;  %v5237_v14 = vpop.f32.mrf.mxu0  ;;  %v2593_v53 = vadd.f32 %v5180_v11, %v2520_v6  ;;  %v2599_v11 = vadd.f32 %v5186_v20, %v2526_v55  ;;  %v2613_v23 = vadd.f32 %v2612_v16, %v2540_v50  ;;  %v2556_v55 = vadd.f32 %v2555_v49, %v5178_v24  ;;  %v5381_v16 = vld [vmem:[#allocation3_spill] sm:$0xff]  ;;  %v5384_v49 = vld [vmem:[#allocation6_spill] sm:$0xff] }
 0x1db   :  { %5377 = vst [vmem:[#allocation19_spill] sm:$0xff] %v5237_v14  ;;  %v5239_v15 = vpop.f32.mrf.mxu1  ;;  %v2625_v24 = vadd.f32 %v5381_v16, %v2552_v27  ;;  %v5385_v50 = vld [vmem:[#allocation7_spill] sm:$0xff]  ;;  %v2692_v6 = vadd.f32 %v2691_v18, %v2619_v26  ;;  %v5394_v27 = vld [vmem:[#allocation13_spill] sm:$0xff] }
 0x1dc   :  { %5378 = vst [vmem:[#allocation20_spill] sm:$0xff] %v5239_v15  ;;  %v2697_v14 = vpop.f32.mrf.mxu0  ;;  %v2666_v57 = vadd.f32 %v2665_v60, %v2593_v53  ;;  %v2686_v29 = vadd.f32 %v2685_v52, %v2613_v23  ;;  %v2672_v38 = vadd.f32 %v2671_v10, %v2599_v11  ;;  %v2629_v44 = vadd.f32 %v5383_v35, %v2556_v55  ;;  %v5386_v60 = vld [vmem:[#allocation12_spill] sm:$0xff] }
 0x1dd   :  { %v5251_v15 = vpop.f32.mrf.mxu1  ;;  %v2678_v52 = vadd.f32 %v2677_v5, %v2605_v25  ;;  %v2741_v39 = vadd.f32 %v5385_v50, %v2668_v37  ;;  %v2680_v36 = vadd.f32 %v5386_v60, %v2607_v47  ;;  %v2682_v10 = vadd.f32 %v5388_v59, %v2609_v63  ;;  %v5390_v5 = vld [vmem:[#allocation16_spill] sm:$0xff] }
 0x1de   :  { %v2699_v40 = vpop.f32.mrf.mxu0  ;;  %v2739_v32 = vadd.f32 %v5384_v49, %v2666_v57  ;;  %v2759_v54 = vadd.f32 %v2758_v4, %v2686_v29  ;;  %v2745_v1 = vadd.f32 %v5389_v9, %v2672_v38  ;;  %v2761_v12 = vadd.f32 %v5390_v5, %v2688_v61 }
 0x1df   :  { %v5274_v20 = vpop.f32.mrf.mxu1  ;;  %v2749_v11 = vadd.f32 %v5391_v28, %v2676_v45  ;;  %v2751_v58 = vadd.f32 %v5392_v33, %v2678_v52  ;;  %v2698_v7 = vadd.f32 %v2697_v14, %v2625_v24  ;;  %v2753_v0 = vadd.f32 %v5394_v27, %v2680_v36  ;;  %v5396_v51 = vld [vmem:[#allocation17_spill] sm:$0xff] }
 0x1e0   :  { %v2701_v53 = vpop.f32.mrf.mxu0  ;;  %v2755_v55 = vadd.f32 %v5395_v34, %v2682_v10  ;;  %v2763_v57 = vadd.f32 %v5396_v51, %v2690_v62  ;;  %v2700_v19 = vadd.f32 %v2699_v40, %v2627_v46 }
 0x1e1   :  { %v2774_v31 = vpop.f32.mrf.mxu1  ;;  %v5397_v37 = vld [vmem:[#allocation18_spill] sm:$0xff]  ;;  %v2771_v61 = vadd.f32 %v5251_v15, %v2698_v7  ;;  %v2702_v41 = vadd.f32 %v2701_v53, %v2629_v44 }
 0x1e2   :  { %v5393_v22 = vld [vmem:[#allocation19_spill] sm:$0xff]  ;;  %v2765_v29 = vadd.f32 %v5397_v37, %v2692_v6  ;;  %v2773_v15 = vadd.f32 %v5274_v20, %v2700_v19 }
 0x1e3   :  { %v2696_v4 = vadd.f32 %v5393_v22, %v2623_v8  ;;  %v5398_v24 = vld [vmem:[#allocation20_spill] sm:$0xff]  ;;  %v2775_v59 = vadd.f32 %v2774_v31, %v2702_v41 }
 0x1e5   :  { %v2769_v38 = vadd.f32 %v5398_v24, %v2696_v4 }
 0x202   :  { %v2811_v17 = vpop.f32.mrf.mxu0 }
 0x203   :  { %v2831_v3 = vpop.f32.mrf.mxu1  ;;  %v2812_v21 = vadd.f32 %v2811_v17, %v2739_v32 }
 0x204   :  { %v2832_v30 = vadd.f32 %v2831_v3, %v2759_v54  ;;  %v2813_v23 = vpop.f32.mrf.mxu0 }
 0x205   :  { %v2833_v48 = vpop.f32.mrf.mxu1  ;;  %v2814_v25 = vadd.f32 %v2813_v23, %v2741_v39  ;;  %v2850_v63 = vmax.f32 %v2812_v21, 0.0 }
 0x206   :  { %v2858_v18 = vmax.f32 %v2832_v30, 0.0  ;;  %v2834_v47 = vadd.f32 %v2833_v48, %v2761_v12  ;;  %v2815_v2 = vpop.f32.mrf.mxu0 }
 0x207   :  { %v2835_v26 = vpop.f32.mrf.mxu1  ;;  %v2851_v16 = vmax.f32 %v2814_v25, 0.0  ;;  %v2816_v14 = vadd.f32 %v2815_v2, %v2743_v56  ;;  %v2878_v54 = vmul.f32 %v5257_v13, %v2850_v63 }
 0x208   :  { %v2859_v8 = vmax.f32 %v2834_v47, 0.0  ;;  %v2836_v35 = vadd.f32 %v2835_v26, %v2763_v57  ;;  %v2817_v45 = vpop.f32.mrf.mxu0  ;;  %v2886_v49 = vmul.f32 %v5257_v13, %v2858_v18 }
 0x209   :  { %v2837_v52 = vpop.f32.mrf.mxu1  ;;  %v2818_v50 = vadd.f32 %v2817_v45, %v2745_v1  ;;  %v2852_v60 = vmax.f32 %v2816_v14, 0.0  ;;  %v2879_v42 = vmul.f32 %v5261_v43, %v2851_v16 }
 0x20a   :  { %v2887_v32 = vmul.f32 %v5261_v43, %v2859_v8  ;;  %v2838_v39 = vadd.f32 %v2837_v52, %v2765_v29  ;;  %v2860_v36 = vmax.f32 %v2836_v35, 0.0  ;;  %v2821_v40 = vpop.f32.mrf.mxu0 }
 0x20b   :  { %v2841_v46 = vpop.f32.mrf.mxu1  ;;  %v2853_v44 = vmax.f32 %v2818_v50, 0.0  ;;  %v2822_v56 = vadd.f32 %v2821_v40, %v2749_v11  ;;  %v2894_v17 = vadd.f32 %v2879_v42, %v2878_v54  ;;  %v2880_v21 = vmul.f32 %v5257_v13, %v2852_v60 }
 0x20c   :  { %v2861_v53 = vmax.f32 %v2838_v39, 0.0  ;;  %v2842_v10 = vadd.f32 %v2841_v46, %v2769_v38  ;;  %v2823_v62 = vpop.f32.mrf.mxu0  ;;  %v2906_v3 = vadd.f32 %v2887_v32, %v2886_v49  ;;  %v2888_v33 = vmul.f32 %v5257_v13, %v2860_v36 }
 0x20d   :  { %v2843_v6 = vpop.f32.mrf.mxu1  ;;  %v2881_v9 = vmul.f32 %v5261_v43, %v2853_v44  ;;  %v2854_v1 = vmax.f32 %v2822_v56, 0.0  ;;  %v2824_v5 = vadd.f32 %v2823_v62, %v2751_v58  ;;  %2895 = vadd.xlane.f32.xlu0 %v2894_v17  ;;  %v2919_v38 = vstv %s5357_s4 }
 0x20e   :  { %v2844_v12 = vadd.f32 %v2843_v6, %v2771_v61  ;;  %v2862_v30 = vmax.f32 %v2842_v10, 0.0  ;;  %v2825_v28 = vpop.f32.mrf.mxu0  ;;  %v2889_v31 = vmul.f32 %v5261_v43, %v2861_v53 }
 0x20f   :  { %v2845_v20 = vpop.f32.mrf.mxu1  ;;  %v2882_v11 = vmul.f32 %v5257_v13, %v2854_v1  ;;  %v2855_v22 = vmax.f32 %v2824_v5, 0.0  ;;  %v2826_v7 = vadd.f32 %v2825_v28, %v2753_v0  ;;  %v2897_v25 = vadd.f32 %v2881_v9, %v2880_v21 }
 0x210   :  { %v2863_v4 = vmax.f32 %v2844_v12, 0.0  ;;  %v2890_v23 = vmul.f32 %v5257_v13, %v2862_v30  ;;  %v2846_v48 = vadd.f32 %v2845_v20, %v2773_v15  ;;  %v2827_v58 = vpop.f32.mrf.mxu0  ;;  %v2909_v18 = vadd.f32 %v2889_v31, %v2888_v33 }
 0x211   :  { %v2847_v27 = vpop.f32.mrf.mxu1  ;;  %v2883_v47 = vmul.f32 %v5261_v43, %v2855_v22  ;;  %v2856_v51 = vmax.f32 %v2826_v7, 0.0  ;;  %v2828_v57 = vadd.f32 %v2827_v58, %v2755_v55  ;;  %2907 = vadd.xlane.f32.xlu0 %v2906_v3 }
 0x212   :  { %v2891_v34 = vmul.f32 %v5261_v43, %v2863_v4  ;;  %v2864_v37 = vmax.f32 %v2846_v48, 0.0  ;;  %v2848_v29 = vadd.f32 %v2847_v27, %v2775_v59  ;;  %2910 = vadd.xlane.f32.xlu1 %v2909_v18 }
 0x213   :  { %v2857_v63 = vmax.f32 %v2828_v57, 0.0  ;;  %v2900_v2 = vadd.f32 %v2883_v47, %v2882_v11  ;;  %v2884_v19 = vmul.f32 %v5257_v13, %v2856_v51 }
 0x214   :  { %v2912_v0 = vadd.f32 %v2891_v34, %v2890_v23  ;;  %v2865_v26 = vmax.f32 %v2848_v29, 0.0  ;;  %v2892_v8 = vmul.f32 %v5257_v13, %v2864_v37 }
 0x215   :  { %v2885_v16 = vmul.f32 %v5261_v43, %v2857_v63  ;;  %2898 = vadd.xlane.f32.xlu0 %v2897_v25 }
 0x216   :  { %v2893_v14 = vmul.f32 %v5261_v43, %v2865_v26  ;;  %2901 = vadd.xlane.f32.xlu1 %v2900_v2 }
 0x217   :  { %v2903_v24 = vadd.f32 %v2885_v16, %v2884_v19 }
 0x218   :  { %v2915_v55 = vadd.f32 %v2893_v14, %v2892_v8 }
 0x219   :  { %2913 = vadd.xlane.f32.xlu0 %v2912_v0 }
 0x21a   :  { %2904 = vadd.xlane.f32.xlu1 %v2903_v24 }
 0x21e   :  { %2916 = vadd.xlane.f32.xlu1 %v2915_v55 }
 0x296   :  { %v2896_v61 = vpop.xlane.xlu0 %2895 }
 0x297   :  { %v2920_v41 = vadd.f32 %v2919_v38, %v2896_v61 }
 0x299   :  { %v2928_v35 = vmax.f32 %v2920_v41, 0.0 }
 0x29a   :  { %v2908_v52 = vpop.xlane.xlu0 %2907 }
 0x29b   :  { %v2911_v45 = vpop.xlane.xlu1 %2910  ;;  %v2936_v49 = vsub.f32 0.0, %v2928_v35  ;;  %v2924_v32 = vadd.f32 %v2919_v38, %v2908_v52 }
 0x29c   :  { %v2925_v13 = vadd.f32 %v2919_v38, %v2911_v45 }
 0x29d   :  { %v2944_v43 = vmul.f32 1.442695, %v2936_v49  ;;  %v2932_v39 = vmax.f32 %v2924_v32, 0.0 }
 0x29e   :  { %v2933_v50 = vmax.f32 %v2925_v13, 0.0  ;;  %v2899_v36 = vpop.xlane.xlu0 %2898 }
 0x29f   :  { %v2902_v60 = vpop.xlane.xlu1 %2901  ;;  %3929 = vpow2.f32 %v2944_v43  ;;  %v2940_v46 = vsub.f32 0.0, %v2932_v39  ;;  %v2921_v42 = vadd.f32 %v2919_v38, %v2899_v36 }
 0x2a0   :  { %v2941_v40 = vsub.f32 0.0, %v2933_v50  ;;  %v2922_v54 = vadd.f32 %v2919_v38, %v2902_v60 }
 0x2a1   :  { %v2952_v44 = vmul.f32 1.442695, %v2940_v46  ;;  %v2929_v56 = vmax.f32 %v2921_v42, 0.0 }
 0x2a2   :  { %v2954_v15 = vmul.f32 1.442695, %v2941_v40  ;;  %v2930_v53 = vmax.f32 %v2922_v54, 0.0  ;;  %v2914_v10 = vpop.xlane.xlu0 %2913 }
 0x2a3   :  { %v2905_v59 = vpop.xlane.xlu1 %2904  ;;  %v2926_v17 = vadd.f32 %v2919_v38, %v2914_v10  ;;  %v2937_v3 = vsub.f32 0.0, %v2929_v56 }
 0x2a4   :  { %3931 = vpow2.f32 %v2954_v15  ;;  %v2938_v62 = vsub.f32 0.0, %v2930_v53  ;;  %v2923_v6 = vadd.f32 %v2919_v38, %v2905_v59 }
 0x2a5   :  { %3933 = vpow2.f32 %v2952_v44  ;;  %v2934_v5 = vmax.f32 %v2926_v17, 0.0  ;;  %v2946_v12 = vmul.f32 1.442695, %v2937_v3 }
 0x2a6   :  { %v2948_v9 = vmul.f32 1.442695, %v2938_v62  ;;  %v2931_v1 = vmax.f32 %v2923_v6, 0.0 }
 0x2a7   :  { %v2917_v21 = vpop.xlane.xlu1 %2916  ;;  %v2942_v28 = vsub.f32 0.0, %v2934_v5 }
 0x2a8   :  { %3935 = vpow2.f32 %v2948_v9  ;;  %v2939_v30 = vsub.f32 0.0, %v2931_v1  ;;  %v2927_v20 = vadd.f32 %v2919_v38, %v2917_v21 }
 0x2a9   :  { %3937 = vpow2.f32 %v2946_v12  ;;  %v2956_v31 = vmul.f32 1.442695, %v2942_v28 }
 0x2aa   :  { %v2950_v33 = vmul.f32 1.442695, %v2939_v30  ;;  %v2935_v11 = vmax.f32 %v2927_v20, 0.0 }
 0x2ac   :  { %3939 = vpow2.f32 %v2950_v33  ;;  %v2943_v22 = vsub.f32 0.0, %v2935_v11  ;;  %v3930_v4 = vpop.eup %3929 }
 0x2ad   :  { %3941 = vpow2.f32 %v2956_v31  ;;  %v2960_v7 = vadd.f32 1.0, %v3930_v4 }
 0x2ae   :  { %v2958_v23 = vmul.f32 1.442695, %v2943_v22 }
 0x2af   :  { %3943 = vrcp.f32 %v2960_v7 }
 0x2b0   :  { %3945 = vpow2.f32 %v2958_v23 }
 0x2b1   :  { %v3932_v48 = vpop.eup %3931 }
 0x2b2   :  { %v3934_v58 = vpop.eup %3933  ;;  %v2965_v27 = vadd.f32 1.0, %v3932_v48 }
 0x2b3   :  { %v2964_v18 = vadd.f32 1.0, %v3934_v58 }
 0x2b4   :  { %3947 = vrcp.f32 %v2965_v27 }
 0x2b5   :  { %v3936_v25 = vpop.eup %3935  ;;  %3949 = vrcp.f32 %v2964_v18 }
 0x2b6   :  { %v3938_v47 = vpop.eup %3937  ;;  %v2962_v34 = vadd.f32 1.0, %v3936_v25 }
 0x2b7   :  { %v2961_v51 = vadd.f32 1.0, %v3938_v47 }
 0x2b8   :  { %3951 = vrcp.f32 %v2962_v34 }
 0x2b9   :  { %v3940_v57 = vpop.eup %3939  ;;  %3953 = vrcp.f32 %v2961_v51 }
 0x2ba   :  { %v3942_v37 = vpop.eup %3941  ;;  %v2963_v29 = vadd.f32 1.0, %v3940_v57 }
 0x2bb   :  { %v2966_v63 = vadd.f32 1.0, %v3942_v37 }
 0x2bc   :  { %3955 = vrcp.f32 %v2963_v29  ;;  %v3944_v2 = vpop.eup %3943 }
 0x2bd   :  { %3957 = vrcp.f32 %v2966_v63  ;;  %v3946_v0 = vpop.eup %3945  ;;  %2985 = vst.msk [vmem:[%s5358_s5] sm:$0xff] %vm2984_vm0, %v3944_v2 }
 0x2be   :  { %v2967_v26 = vadd.f32 1.0, %v3946_v0 }
 0x2c0   :  { %3959 = vrcp.f32 %v2967_v26 }
 0x2c1   :  { %v3948_v19 = vpop.eup %3947 }
 0x2c2   :  { %v3950_v16 = vpop.eup %3949  ;;  %2990 = vst.msk [vmem:[%s5358_s5 + $0x28] sm:$0xff] %vm2984_vm0, %v3948_v19 }
 0x2c3   :  { %2989 = vst.msk [vmem:[%s5358_s5 + $0x20] sm:$0xff] %vm2984_vm0, %v3950_v16 }
 0x2c5   :  { %v3952_v8 = vpop.eup %3951 }
 0x2c6   :  { %v3954_v14 = vpop.eup %3953  ;;  %2987 = vst.msk [vmem:[%s5358_s5 + $0x10] sm:$0xff] %vm2984_vm0, %v3952_v8 }
 0x2c7   :  { %2986 = vst.msk [vmem:[%s5358_s5 + $0x8] sm:$0xff] %vm2984_vm0, %v3954_v14 }
 0x2c9   :  { %v3956_v24 = vpop.eup %3955 }
 0x2ca   :  { %v3958_v55 = vpop.eup %3957  ;;  %2988 = vst.msk [vmem:[%s5358_s5 + $0x18] sm:$0xff] %vm2984_vm0, %v3956_v24 }
 0x2cb   :  { %2991 = vst.msk [vmem:[%s5358_s5 + $0x30] sm:$0xff] %vm2984_vm0, %v3958_v55 }
 0x2cd   :  { %v3960_v38 = vpop.eup %3959 }
 0x2ce   :  { %2992 = vst.msk [vmem:[%s5358_s5 + $0x38] sm:$0xff] %vm2984_vm0, %v3960_v38 }

</bundles_post_ra>
